<compile_context>
chip_gen: v7x
topology: tpu7x:2x2x1
jax: 0.10.0
libtpu: 0.0.40
codegen_flags: <defaults>
</compile_context>

<pallas_src>
import functools
import math

import jax
import jax.numpy as jnp
from jax.experimental import pallas as pl
from jax.experimental.pallas import tpu as pltpu

ATTR = 6            # attributes
EMB_TYPE = 5        # embedding_type (forced to 5 in __init__)
O_IN = 7            # objects in the input sequence (before CLS prepend)
HID = 32            # BERT hidden size
NUM_HEADS = 4
HEAD_DIM = HID // NUM_HEADS
NUM_LAYERS = 2
INTER = 64          # BERT intermediate size
LN_EPS = 1e-12      # HF BERT layer_norm_eps
VEC_W = 64          # lane width of the f32 bias/vector slab (>= INTER for b1)
MAT_W = 64          # lane width of the bf16 weight slab (>= INTER for W1)


def _ceil_to(x, m):
    return (x + m - 1) // m * m


def _layernorm(x, g, b, eps=LN_EPS):
    mu = jnp.mean(x, axis=-1, keepdims=True)
    var = jnp.mean(jnp.square(x - mu), axis=-1, keepdims=True)
    return (x - mu) * jax.lax.rsqrt(var + eps) * g + b


def _gelu(x):
    # TODO(synk): HF BERT "gelu" is the exact erf form; tanh approximation used in-kernel
    # (guaranteed EUP/Mosaic lowering), max deviation ~1e-3.
    c = math.sqrt(2.0 / math.pi)
    return 0.5 * x * (1.0 + jnp.tanh(c * (x + 0.044715 * x * x * x)))


# ----------------------------------------------------------------------------
# Single fused kernel: embedding layer + NUM_LAYERS BERT encoder layers
# ----------------------------------------------------------------------------
def fused_bert_kernel(x_ref, vec_ref, mat_ref, out_ref, *, B, O, voff, moff, full_output):
    N = B * O
    f32 = jnp.float32
    bf16 = jnp.bfloat16

    def vec(name, rows=1, width=HID):          # f32 slab slice
        r = voff[name]
        return vec_ref[r:r + rows, :width]

    def mat(name, rows, width):                # bf16 slab slice
        r = moff[name]
        return mat_ref[r:r + rows, :width]

    # ---------------- embedding layer ----------------
    data = x_ref[:, :ATTR]                     # (N, ATTR)
    t = x_ref[:, ATTR:ATTR + 1]                # (N, 1) float type code

    tok = jnp.dot(data, vec('w_tok', ATTR), preferred_element_type=f32) + vec('b_tok')

    car = (t == 2.0).astype(f32)
    route = (t == 1.0).astype(f32)
    road = (t == 3.0).astype(f32)
    sdc = (t == 4.0).astype(f32)
    pad = (t == 0.0).astype(f32)
    other = 1.0 - jnp.minimum(car + route + road + sdc + pad, 1.0)
    not_pad = 1.0 - pad

    # per-type object embedding rows, 'bicycle' mask order: [car, route, road, other, sdc]
    ov = vec('ov', EMB_TYPE)                   # (EMB_TYPE, HID)
    obj_add = (car * ov[0:1] + route * ov[1:2] + road * ov[2:3]
               + other * ov[3:4] + sdc * ov[4:5])

    # TODO(synk): nn.Dropout(0.5) and BERT emb/attn/hidden dropouts are eval-mode identity.
    h = _layernorm(not_pad * tok + obj_add + vec('pos', N),
                   vec('ln_emb_g'), vec('ln_emb_b'))                 # (N, HID) f32

    # ---------------- transformer layers ----------------
    scale = 1.0 / math.sqrt(HEAD_DIM)

    def to_heads(x2d):
        # (N, HID) -> (NUM_HEADS*B, O, HEAD_DIM), head-major batch: lane slices + sublane
        # concat + layout-preserving reshape only (no transpose).
        parts = [x2d[:, i * HEAD_DIM:(i + 1) * HEAD_DIM] for i in range(NUM_HEADS)]
        return jnp.concatenate(parts, axis=0).reshape(NUM_HEADS * B, O, HEAD_DIM)

    for l in range(NUM_LAYERS):
        hb = h.astype(bf16)
        q = jnp.dot(hb, mat(f'wq{l}', HID, HID), preferred_element_type=f32) + vec(f'bq{l}')
        k = jnp.dot(hb, mat(f'wk{l}', HID, HID), preferred_element_type=f32) + vec(f'bk{l}')
        v = jnp.dot(hb, mat(f'wv{l}', HID, HID), preferred_element_type=f32) + vec(f'bv{l}')

        qh = to_heads(q).astype(bf16)
        kh = to_heads(k).astype(bf16)
        vh = to_heads(v).astype(bf16)

        # No attention mask: the reference calls BertModel without one (all-ones mask),
        # so padded tokens attend as keys/values there too.
        s = jnp.einsum('bqd,bkd->bqk', qh, kh, preferred_element_type=f32) * scale
        s = s - jnp.max(s, axis=-1, keepdims=True)
        p = jnp.exp(s)
        p = p * pl.reciprocal(jnp.sum(p, axis=-1, keepdims=True), approx=True)
        ctx = jnp.einsum('bqk,bkd->bqd', p.astype(bf16), vh, preferred_element_type=f32)

        # merge heads back to (N, HID) in standard head-concat column order
        ctx = ctx.reshape(NUM_HEADS, N, HEAD_DIM)
        ctx2d = jnp.concatenate([ctx[i] for i in range(NUM_HEADS)], axis=-1)

        attn = (jnp.dot(ctx2d.astype(bf16), mat(f'wo{l}', HID, HID),
                        preferred_element_type=f32) + vec(f'bo{l}'))
        h1 = _layernorm(h + attn, vec(f'ln1g{l}'), vec(f'ln1b{l}'))

        ffn = (jnp.dot(h1.astype(bf16), mat(f'w1{l}', HID, INTER),
                       preferred_element_type=f32) + vec(f'b1{l}', width=INTER))
        ffn = _gelu(ffn)
        ffn = (jnp.dot(ffn.astype(bf16), mat(f'w2{l}', INTER, HID),
                       preferred_element_type=f32) + vec(f'b2{l}'))
        h = _layernorm(h1 + ffn, vec(f'ln2g{l}'), vec(f'ln2b{l}'))

    if full_output:
        out_ref[...] = h                                             # (N, HID)
    else:
        out_ref[...] = h.reshape(B, O, HID)[:, 0, :]                 # CLS rows -> (B, HID)


# ----------------------------------------------------------------------------
# Wrapper: CLS concat, slab packing, single grid-free pallas_call
# ----------------------------------------------------------------------------
def _build_slab(entries, width, align, dtype):
    """Row-stack (name, 2-D array) entries into one slab; returns (slab, row-offset dict)."""
    blocks, offsets, r = [], {}, 0
    for name, a in entries:
        a = jnp.asarray(a, jnp.float32)
        rows = a.shape[0]
        alloc = _ceil_to(rows, align)
        blocks.append(jnp.pad(a, ((0, alloc - rows), (0, width - a.shape[1]))))
        offsets[name] = r
        r += alloc
    return jnp.concatenate(blocks, axis=0).astype(dtype), offsets


def bert_encoder_forward(x, params, return_full_length=False):
    B, O_in, _ = x.shape
    O = O_in + 1
    N = B * O

    # CLS prepend, then repack each token as [attributes | type_code] (data at lane 0).
    cls = jnp.broadcast_to(params['cls_emb'][None], (B, 1, ATTR + 1))
    xfull = jnp.concatenate([cls, x], axis=1)                        # (B, O, ATTR+1)
    x_slab = jnp.concatenate([xfull[:, :, 1:], xfull[:, :, :1]],
                             axis=-1).reshape(N, ATTR + 1)

    # Weight-only precomputes (constant-folded under jit since params are closed over).
    ov = (jnp.einsum('ea,eah->eh', params['obj_tok'][:, 0, :], params['w_obj'])
          + params['b_obj'][:, 0, :])                                # (EMB_TYPE, HID)
    pos_type = jnp.tile(params['pos_emb'][:O] + params['type_emb'], (B, 1))  # (N, HID)

    vec_entries = [('w_tok', params['w_tok']), ('ov', ov), ('pos', pos_type),
                   ('b_tok', params['b_tok']),
                   ('ln_emb_g', params['ln_emb_g']), ('ln_emb_b', params['ln_emb_b'])]
    mat_entries = []
    for l in range(NUM_LAYERS):
        vec_entries += [(f'bq{l}', params['bq'][l]), (f'bk{l}', params['bk'][l]),
                        (f'bv{l}', params['bv'][l]), (f'bo{l}', params['bo'][l]),
                        (f'ln1g{l}', params['ln1_g'][l]), (f'ln1b{l}', params['ln1_b'][l]),
                        (f'b1{l}', params['b1'][l]), (f'b2{l}', params['b2'][l]),
                        (f'ln2g{l}', params['ln2_g'][l]), (f'ln2b{l}', params['ln2_b'][l])]
        mat_entries += [(f'wq{l}', params['wq'][l]), (f'wk{l}', params['wk'][l]),
                        (f'wv{l}', params['wv'][l]), (f'wo{l}', params['wo'][l]),
                        (f'w1{l}', params['w1'][l]), (f'w2{l}', params['w2'][l])]

    vec_slab, voff = _build_slab(vec_entries, VEC_W, 8, jnp.float32)
    mat_slab, moff = _build_slab(mat_entries, MAT_W, 16, jnp.bfloat16)

    out_rows = N if return_full_length else B
    flops = int(2 * N * ATTR * HID
                + NUM_LAYERS * (4 * 2 * N * HID * HID                 # Wq,Wk,Wv,Wo
                                + 2 * 2 * B * NUM_HEADS * O * O * HEAD_DIM  # scores+ctx
                                + 2 * 2 * N * HID * INTER))           # FFN
    cost = pl.CostEstimate(
        flops=flops,
        transcendentals=int(NUM_LAYERS * (B * NUM_HEADS * O * O + N * INTER)),
        bytes_accessed=int(x_slab.size * 4 + vec_slab.size * 4 + mat_slab.size * 2
                           + out_rows * HID * 4))

    vmem = pl.BlockSpec(memory_space=pltpu.MemorySpace.VMEM)
    out = pl.pallas_call(
        functools.partial(fused_bert_kernel, B=B, O=O, voff=voff, moff=moff,
                          full_output=return_full_length),
        out_shape=jax.ShapeDtypeStruct((out_rows, HID), jnp.float32),
        in_specs=[vmem, vmem, vmem],
        out_specs=vmem,
        cost_estimate=cost,
    )(x_slab, vec_slab, mat_slab)

    if return_full_length:
        return out.reshape(B, O, HID)
    return out                                                       # (B, HID) CLS feature


# ----------------------------------------------------------------------------
# Deterministic synthetic parameters (no checkpoint load)
# ----------------------------------------------------------------------------
def init_params(key):
    ks = jax.random.split(key, 24)
    O = O_IN + 1

    def nrm(k, shape, scale=0.02):
        return scale * jax.random.normal(k, shape, dtype=jnp.float32)

    return {
        'cls_emb': jax.random.normal(ks[0], (1, ATTR + 1), jnp.float32),
        'w_tok': nrm(ks[1], (ATTR, HID)),
        'b_tok': nrm(ks[2], (1, HID)),
        'obj_tok': jax.random.normal(ks[3], (EMB_TYPE, 1, ATTR), jnp.float32),
        'w_obj': nrm(ks[4], (EMB_TYPE, ATTR, HID)),
        'b_obj': nrm(ks[5], (EMB_TYPE, 1, HID)),
        'pos_emb': nrm(ks[6], (O, HID)),
        'type_emb': nrm(ks[7], (1, HID)),
        'ln_emb_g': jnp.ones((1, HID), jnp.float32),
        'ln_emb_b': jnp.zeros((1, HID), jnp.float32),
        'wq': nrm(ks[8], (NUM_LAYERS, HID, HID)),
        'wk': nrm(ks[9], (NUM_LAYERS, HID, HID)),
        'wv': nrm(ks[10], (NUM_LAYERS, HID, HID)),
        'bq': nrm(ks[11], (NUM_LAYERS, 1, HID)),
        'bk': nrm(ks[12], (NUM_LAYERS, 1, HID)),
        'bv': nrm(ks[13], (NUM_LAYERS, 1, HID)),
        'wo': nrm(ks[14], (NUM_LAYERS, HID, HID)),
        'bo': nrm(ks[15], (NUM_LAYERS, 1, HID)),
        'ln1_g': jnp.ones((NUM_LAYERS, 1, HID), jnp.float32),
        'ln1_b': jnp.zeros((NUM_LAYERS, 1, HID), jnp.float32),
        'w1': nrm(ks[16], (NUM_LAYERS, HID, INTER)),
        'b1': nrm(ks[17], (NUM_LAYERS, 1, INTER)),
        'w2': nrm(ks[18], (NUM_LAYERS, INTER, HID)),
        'b2': nrm(ks[19], (NUM_LAYERS, 1, HID)),
        'ln2_g': jnp.ones((NUM_LAYERS, 1, HID), jnp.float32),
        'ln2_b': jnp.zeros((NUM_LAYERS, 1, HID), jnp.float32),
    }


if __name__ == "__main__":
    B = 2
    key = jax.random.PRNGKey(0)
    kp, kt, kd = jax.random.split(key, 3)
    params = init_params(kp)

    # input x: (B, objects, attributes+1); column 0 is the integer-valued type code
    type_vals = jax.random.randint(kt, (B, O_IN), 0, 5).astype(jnp.float32)
    data_vals = jax.random.normal(kd, (B, O_IN, ATTR), jnp.float32)
    x = jnp.concatenate([type_vals[..., None], data_vals], axis=-1)   # (2, 7, 7)

    fea = jax.jit(lambda xx: bert_encoder_forward(xx, params))(x)
    fea = jax.block_until_ready(fea)
    assert fea.shape == (B, HID) and bool(jnp.all(jnp.isfinite(fea)))
    print("KERNEL_OK")
</pallas_src>

<mosaic_0001>
module attributes {stable_mosaic.version = 11 : i64} {
  func.func @fused_bert_kernel(%arg0: memref<16x7xf32, #tpu.memory_space<vmem>>, %arg1: memref<216x64xf32, #tpu.memory_space<vmem>>, %arg2: memref<448x64xbf16, #tpu.memory_space<vmem>>, %arg3: memref<2x32xf32, #tpu.memory_space<vmem>>) attributes {dimension_semantics = [], scalar_prefetch = 0 : i64, scratch_operands = 0 : i64, tpu.core_type = #tpu.core_type<tc>} {
    %c0 = arith.constant 0 : index
    %c0_0 = arith.constant 0 : index
    %0 = vector.load %arg0[%c0, %c0_0] : memref<16x7xf32, #tpu.memory_space<vmem>>, vector<16x6xf32>
    %c0_1 = arith.constant 0 : index
    %c6 = arith.constant 6 : index
    %1 = vector.load %arg0[%c0_1, %c6] : memref<16x7xf32, #tpu.memory_space<vmem>>, vector<16x1xf32>
    %c0_2 = arith.constant 0 : index
    %c0_3 = arith.constant 0 : index
    %2 = vector.load %arg1[%c0_2, %c0_3] : memref<216x64xf32, #tpu.memory_space<vmem>>, vector<6x32xf32>
    %cst = arith.constant dense<0.000000e+00> : vector<16x32xf32>
    %3 = tpu.matmul %0, %2, %cst {dimension_numbers = #tpu.dot_dimension_numbers<[1], [0], [0], [1], [0, 0, 1, 1], [], []>} : vector<16x6xf32>, vector<6x32xf32>, vector<16x32xf32> -> vector<16x32xf32>
    %c32 = arith.constant 32 : index
    %c0_4 = arith.constant 0 : index
    %4 = vector.load %arg1[%c32, %c0_4] : memref<216x64xf32, #tpu.memory_space<vmem>>, vector<1x32xf32>
    %5 = vector.broadcast %4 : vector<1x32xf32> to vector<16x32xf32>
    %6 = arith.addf %3, %5 : vector<16x32xf32>
    %cst_5 = arith.constant 2.000000e+00 : f32
    %7 = vector.broadcast %cst_5 : f32 to vector<16x1xf32>
    %8 = arith.cmpf oeq, %1, %7 : vector<16x1xf32>
    %9 = arith.extui %8 : vector<16x1xi1> to vector<16x1xi32>
    %10 = arith.sitofp %9 : vector<16x1xi32> to vector<16x1xf32>
    %cst_6 = arith.constant 1.000000e+00 : f32
    %11 = vector.broadcast %cst_6 : f32 to vector<16x1xf32>
    %12 = arith.cmpf oeq, %1, %11 : vector<16x1xf32>
    %13 = arith.extui %12 : vector<16x1xi1> to vector<16x1xi32>
    %14 = arith.sitofp %13 : vector<16x1xi32> to vector<16x1xf32>
    %cst_7 = arith.constant 3.000000e+00 : f32
    %15 = vector.broadcast %cst_7 : f32 to vector<16x1xf32>
    %16 = arith.cmpf oeq, %1, %15 : vector<16x1xf32>
    %17 = arith.extui %16 : vector<16x1xi1> to vector<16x1xi32>
    %18 = arith.sitofp %17 : vector<16x1xi32> to vector<16x1xf32>
    %cst_8 = arith.constant 4.000000e+00 : f32
    %19 = vector.broadcast %cst_8 : f32 to vector<16x1xf32>
    %20 = arith.cmpf oeq, %1, %19 : vector<16x1xf32>
    %21 = arith.extui %20 : vector<16x1xi1> to vector<16x1xi32>
    %22 = arith.sitofp %21 : vector<16x1xi32> to vector<16x1xf32>
    %cst_9 = arith.constant 0.000000e+00 : f32
    %23 = vector.broadcast %cst_9 : f32 to vector<16x1xf32>
    %24 = arith.cmpf oeq, %1, %23 : vector<16x1xf32>
    %25 = arith.extui %24 : vector<16x1xi1> to vector<16x1xi32>
    %26 = arith.sitofp %25 : vector<16x1xi32> to vector<16x1xf32>
    %27 = arith.addf %10, %14 : vector<16x1xf32>
    %28 = arith.addf %27, %18 : vector<16x1xf32>
    %29 = arith.addf %28, %22 : vector<16x1xf32>
    %30 = arith.addf %29, %26 : vector<16x1xf32>
    %cst_10 = arith.constant 1.000000e+00 : f32
    %31 = vector.broadcast %cst_10 : f32 to vector<16x1xf32>
    %32 = arith.minimumf %30, %31 : vector<16x1xf32>
    %cst_11 = arith.constant 1.000000e+00 : f32
    %33 = vector.broadcast %cst_11 : f32 to vector<16x1xf32>
    %34 = arith.subf %33, %32 : vector<16x1xf32>
    %cst_12 = arith.constant 1.000000e+00 : f32
    %35 = vector.broadcast %cst_12 : f32 to vector<16x1xf32>
    %36 = arith.subf %35, %26 : vector<16x1xf32>
    %c8 = arith.constant 8 : index
    %c0_13 = arith.constant 0 : index
    %37 = vector.load %arg1[%c8, %c0_13] : memref<216x64xf32, #tpu.memory_space<vmem>>, vector<5x32xf32>
    %38 = vector.extract_strided_slice %37 {offsets = [0, 0], sizes = [1, 32], strides = [1, 1]} : vector<5x32xf32> to vector<1x32xf32>
    %39 = vector.broadcast %10 : vector<16x1xf32> to vector<16x32xf32>
    %40 = vector.broadcast %38 : vector<1x32xf32> to vector<16x32xf32>
    %41 = arith.mulf %39, %40 : vector<16x32xf32>
    %42 = vector.extract_strided_slice %37 {offsets = [1, 0], sizes = [1, 32], strides = [1, 1]} : vector<5x32xf32> to vector<1x32xf32>
    %43 = vector.broadcast %14 : vector<16x1xf32> to vector<16x32xf32>
    %44 = vector.broadcast %42 : vector<1x32xf32> to vector<16x32xf32>
    %45 = arith.mulf %43, %44 : vector<16x32xf32>
    %46 = arith.addf %41, %45 : vector<16x32xf32>
    %47 = vector.extract_strided_slice %37 {offsets = [2, 0], sizes = [1, 32], strides = [1, 1]} : vector<5x32xf32> to vector<1x32xf32>
    %48 = vector.broadcast %18 : vector<16x1xf32> to vector<16x32xf32>
    %49 = vector.broadcast %47 : vector<1x32xf32> to vector<16x32xf32>
    %50 = arith.mulf %48, %49 : vector<16x32xf32>
    %51 = arith.addf %46, %50 : vector<16x32xf32>
    %52 = vector.extract_strided_slice %37 {offsets = [3, 0], sizes = [1, 32], strides = [1, 1]} : vector<5x32xf32> to vector<1x32xf32>
    %53 = vector.broadcast %34 : vector<16x1xf32> to vector<16x32xf32>
    %54 = vector.broadcast %52 : vector<1x32xf32> to vector<16x32xf32>
    %55 = arith.mulf %53, %54 : vector<16x32xf32>
    %56 = arith.addf %51, %55 : vector<16x32xf32>
    %57 = vector.extract_strided_slice %37 {offsets = [4, 0], sizes = [1, 32], strides = [1, 1]} : vector<5x32xf32> to vector<1x32xf32>
    %58 = vector.broadcast %22 : vector<16x1xf32> to vector<16x32xf32>
    %59 = vector.broadcast %57 : vector<1x32xf32> to vector<16x32xf32>
    %60 = arith.mulf %58, %59 : vector<16x32xf32>
    %61 = arith.addf %56, %60 : vector<16x32xf32>
    %62 = vector.broadcast %36 : vector<16x1xf32> to vector<16x32xf32>
    %63 = arith.mulf %62, %6 : vector<16x32xf32>
    %64 = arith.addf %63, %61 : vector<16x32xf32>
    %c16 = arith.constant 16 : index
    %c0_14 = arith.constant 0 : index
    %65 = vector.load %arg1[%c16, %c0_14] : memref<216x64xf32, #tpu.memory_space<vmem>>, vector<16x32xf32>
    %66 = arith.addf %64, %65 : vector<16x32xf32>
    %c40 = arith.constant 40 : index
    %c0_15 = arith.constant 0 : index
    %67 = vector.load %arg1[%c40, %c0_15] : memref<216x64xf32, #tpu.memory_space<vmem>>, vector<1x32xf32>
    %c48 = arith.constant 48 : index
    %c0_16 = arith.constant 0 : index
    %68 = vector.load %arg1[%c48, %c0_16] : memref<216x64xf32, #tpu.memory_space<vmem>>, vector<1x32xf32>
    %cst_17 = arith.constant dense<0.000000e+00> : vector<16xf32>
    %69 = vector.multi_reduction <add>, %66, %cst_17 [1] : vector<16x32xf32> to vector<16xf32>
    %70 = vector.shape_cast %69 : vector<16xf32> to vector<16x1xf32>
    %cst_18 = arith.constant 3.200000e+01 : f32
    %71 = vector.broadcast %cst_18 : f32 to vector<16x1xf32>
    %72 = arith.divf %70, %71 : vector<16x1xf32>
    %73 = vector.broadcast %72 : vector<16x1xf32> to vector<16x32xf32>
    %74 = arith.subf %66, %73 : vector<16x32xf32>
    %75 = arith.mulf %74, %74 : vector<16x32xf32>
    %cst_19 = arith.constant dense<0.000000e+00> : vector<16xf32>
    %76 = vector.multi_reduction <add>, %75, %cst_19 [1] : vector<16x32xf32> to vector<16xf32>
    %77 = vector.shape_cast %76 : vector<16xf32> to vector<16x1xf32>
    %cst_20 = arith.constant 3.200000e+01 : f32
    %78 = vector.broadcast %cst_20 : f32 to vector<16x1xf32>
    %79 = arith.divf %77, %78 : vector<16x1xf32>
    %80 = vector.broadcast %72 : vector<16x1xf32> to vector<16x32xf32>
    %81 = arith.subf %66, %80 : vector<16x32xf32>
    %cst_21 = arith.constant 9.99999996E-13 : f32
    %82 = vector.broadcast %cst_21 : f32 to vector<16x1xf32>
    %83 = arith.addf %79, %82 : vector<16x1xf32>
    %84 = math.rsqrt %83 : vector<16x1xf32>
    %85 = vector.broadcast %84 : vector<16x1xf32> to vector<16x32xf32>
    %86 = arith.mulf %81, %85 : vector<16x32xf32>
    %87 = vector.broadcast %67 : vector<1x32xf32> to vector<16x32xf32>
    %88 = arith.mulf %86, %87 : vector<16x32xf32>
    %89 = vector.broadcast %68 : vector<1x32xf32> to vector<16x32xf32>
    %90 = arith.addf %88, %89 : vector<16x32xf32>
    %91 = arith.truncf %90 : vector<16x32xf32> to vector<16x32xbf16>
    %c0_22 = arith.constant 0 : index
    %c0_23 = arith.constant 0 : index
    %92 = vector.load %arg2[%c0_22, %c0_23] : memref<448x64xbf16, #tpu.memory_space<vmem>>, vector<32x32xbf16>
    %cst_24 = arith.constant dense<0.000000e+00> : vector<16x32xf32>
    %93 = tpu.matmul %91, %92, %cst_24 {dimension_numbers = #tpu.dot_dimension_numbers<[1], [0], [0], [1], [0, 0, 1, 1], [], []>} : vector<16x32xbf16>, vector<32x32xbf16>, vector<16x32xf32> -> vector<16x32xf32>
    %c56 = arith.constant 56 : index
    %c0_25 = arith.constant 0 : index
    %94 = vector.load %arg1[%c56, %c0_25] : memref<216x64xf32, #tpu.memory_space<vmem>>, vector<1x32xf32>
    %95 = vector.broadcast %94 : vector<1x32xf32> to vector<16x32xf32>
    %96 = arith.addf %93, %95 : vector<16x32xf32>
    %c32_26 = arith.constant 32 : index
    %c0_27 = arith.constant 0 : index
    %97 = vector.load %arg2[%c32_26, %c0_27] : memref<448x64xbf16, #tpu.memory_space<vmem>>, vector<32x32xbf16>
    %cst_28 = arith.constant dense<0.000000e+00> : vector<16x32xf32>
    %98 = tpu.matmul %91, %97, %cst_28 {dimension_numbers = #tpu.dot_dimension_numbers<[1], [0], [0], [1], [0, 0, 1, 1], [], []>} : vector<16x32xbf16>, vector<32x32xbf16>, vector<16x32xf32> -> vector<16x32xf32>
    %c64 = arith.constant 64 : index
    %c0_29 = arith.constant 0 : index
    %99 = vector.load %arg1[%c64, %c0_29] : memref<216x64xf32, #tpu.memory_space<vmem>>, vector<1x32xf32>
    %100 = vector.broadcast %99 : vector<1x32xf32> to vector<16x32xf32>
    %101 = arith.addf %98, %100 : vector<16x32xf32>
    %c64_30 = arith.constant 64 : index
    %c0_31 = arith.constant 0 : index
    %102 = vector.load %arg2[%c64_30, %c0_31] : memref<448x64xbf16, #tpu.memory_space<vmem>>, vector<32x32xbf16>
    %cst_32 = arith.constant dense<0.000000e+00> : vector<16x32xf32>
    %103 = tpu.matmul %91, %102, %cst_32 {dimension_numbers = #tpu.dot_dimension_numbers<[1], [0], [0], [1], [0, 0, 1, 1], [], []>} : vector<16x32xbf16>, vector<32x32xbf16>, vector<16x32xf32> -> vector<16x32xf32>
    %c72 = arith.constant 72 : index
    %c0_33 = arith.constant 0 : index
    %104 = vector.load %arg1[%c72, %c0_33] : memref<216x64xf32, #tpu.memory_space<vmem>>, vector<1x32xf32>
    %105 = vector.broadcast %104 : vector<1x32xf32> to vector<16x32xf32>
    %106 = arith.addf %103, %105 : vector<16x32xf32>
    %107 = vector.extract_strided_slice %96 {offsets = [0, 0], sizes = [16, 8], strides = [1, 1]} : vector<16x32xf32> to vector<16x8xf32>
    %108 = vector.extract_strided_slice %96 {offsets = [0, 8], sizes = [16, 8], strides = [1, 1]} : vector<16x32xf32> to vector<16x8xf32>
    %109 = vector.extract_strided_slice %96 {offsets = [0, 16], sizes = [16, 8], strides = [1, 1]} : vector<16x32xf32> to vector<16x8xf32>
    %110 = vector.extract_strided_slice %96 {offsets = [0, 24], sizes = [16, 8], strides = [1, 1]} : vector<16x32xf32> to vector<16x8xf32>
    %111 = tpu.concatenate %107, %108, %109, %110 in 0 : vector<16x8xf32>, vector<16x8xf32>, vector<16x8xf32>, vector<16x8xf32> -> vector<64x8xf32>
    %112 = vector.shape_cast %111 : vector<64x8xf32> to vector<8x8x8xf32>
    %113 = arith.truncf %112 : vector<8x8x8xf32> to vector<8x8x8xbf16>
    %114 = vector.extract_strided_slice %101 {offsets = [0, 0], sizes = [16, 8], strides = [1, 1]} : vector<16x32xf32> to vector<16x8xf32>
    %115 = vector.extract_strided_slice %101 {offsets = [0, 8], sizes = [16, 8], strides = [1, 1]} : vector<16x32xf32> to vector<16x8xf32>
    %116 = vector.extract_strided_slice %101 {offsets = [0, 16], sizes = [16, 8], strides = [1, 1]} : vector<16x32xf32> to vector<16x8xf32>
    %117 = vector.extract_strided_slice %101 {offsets = [0, 24], sizes = [16, 8], strides = [1, 1]} : vector<16x32xf32> to vector<16x8xf32>
    %118 = tpu.concatenate %114, %115, %116, %117 in 0 : vector<16x8xf32>, vector<16x8xf32>, vector<16x8xf32>, vector<16x8xf32> -> vector<64x8xf32>
    %119 = vector.shape_cast %118 : vector<64x8xf32> to vector<8x8x8xf32>
    %120 = arith.truncf %119 : vector<8x8x8xf32> to vector<8x8x8xbf16>
    %121 = vector.extract_strided_slice %106 {offsets = [0, 0], sizes = [16, 8], strides = [1, 1]} : vector<16x32xf32> to vector<16x8xf32>
    %122 = vector.extract_strided_slice %106 {offsets = [0, 8], sizes = [16, 8], strides = [1, 1]} : vector<16x32xf32> to vector<16x8xf32>
    %123 = vector.extract_strided_slice %106 {offsets = [0, 16], sizes = [16, 8], strides = [1, 1]} : vector<16x32xf32> to vector<16x8xf32>
    %124 = vector.extract_strided_slice %106 {offsets = [0, 24], sizes = [16, 8], strides = [1, 1]} : vector<16x32xf32> to vector<16x8xf32>
    %125 = tpu.concatenate %121, %122, %123, %124 in 0 : vector<16x8xf32>, vector<16x8xf32>, vector<16x8xf32>, vector<16x8xf32> -> vector<64x8xf32>
    %126 = vector.shape_cast %125 : vector<64x8xf32> to vector<8x8x8xf32>
    %127 = arith.truncf %126 : vector<8x8x8xf32> to vector<8x8x8xbf16>
    "tpu.trace_start"() <{level = 10 : i32, message = "bqd,bkd->bqk"}> : () -> ()
    %cst_34 = arith.constant dense<0.000000e+00> : vector<8x8x8xf32>
    %128 = tpu.matmul %113, %120, %cst_34 {dimension_numbers = #tpu.dot_dimension_numbers<[2], [2], [1], [1], [0, 0, 0, 1, 1, 1], [0], [0]>} : vector<8x8x8xbf16>, vector<8x8x8xbf16>, vector<8x8x8xf32> -> vector<8x8x8xf32>
    "tpu.trace_stop"() : () -> ()
    %cst_35 = arith.constant 0.353553385 : f32
    %129 = vector.broadcast %cst_35 : f32 to vector<8x8x8xf32>
    %130 = arith.mulf %128, %129 : vector<8x8x8xf32>
    %cst_36 = arith.constant dense<0xFF800000> : vector<8x8xf32>
    %131 = vector.multi_reduction <maximumf>, %130, %cst_36 [2] : vector<8x8x8xf32> to vector<8x8xf32>
    %132 = vector.shape_cast %131 : vector<8x8xf32> to vector<8x8x1xf32>
    %133 = vector.broadcast %132 : vector<8x8x1xf32> to vector<8x8x8xf32>
    %134 = arith.subf %130, %133 : vector<8x8x8xf32>
    %135 = math.exp %134 : vector<8x8x8xf32>
    %cst_37 = arith.constant dense<0.000000e+00> : vector<8x8xf32>
    %136 = vector.multi_reduction <add>, %135, %cst_37 [2] : vector<8x8x8xf32> to vector<8x8xf32>
    %137 = vector.shape_cast %136 : vector<8x8xf32> to vector<8x8x1xf32>
    %138 = tpu.reciprocal %137 {approx = true} : vector<8x8x1xf32> -> vector<8x8x1xf32>
    %139 = vector.broadcast %138 : vector<8x8x1xf32> to vector<8x8x8xf32>
    %140 = arith.mulf %135, %139 : vector<8x8x8xf32>
    %141 = arith.truncf %140 : vector<8x8x8xf32> to vector<8x8x8xbf16>
    "tpu.trace_start"() <{level = 10 : i32, message = "bqk,bkd->bqd"}> : () -> ()
    %cst_38 = arith.constant dense<0.000000e+00> : vector<8x8x8xf32>
    %142 = tpu.matmul %141, %127, %cst_38 {dimension_numbers = #tpu.dot_dimension_numbers<[2], [1], [1], [2], [0, 0, 0, 1, 1, 2], [0], [0]>} : vector<8x8x8xbf16>, vector<8x8x8xbf16>, vector<8x8x8xf32> -> vector<8x8x8xf32>
    "tpu.trace_stop"() : () -> ()
    %143 = vector.shape_cast %142 : vector<8x8x8xf32> to vector<4x16x8xf32>
    %144 = vector.extract_strided_slice %143 {offsets = [0, 0, 0], sizes = [1, 16, 8], strides = [1, 1, 1]} : vector<4x16x8xf32> to vector<1x16x8xf32>
    %145 = vector.shape_cast %144 : vector<1x16x8xf32> to vector<16x8xf32>
    %146 = vector.extract_strided_slice %143 {offsets = [1, 0, 0], sizes = [1, 16, 8], strides = [1, 1, 1]} : vector<4x16x8xf32> to vector<1x16x8xf32>
    %147 = vector.shape_cast %146 : vector<1x16x8xf32> to vector<16x8xf32>
    %148 = vector.extract_strided_slice %143 {offsets = [2, 0, 0], sizes = [1, 16, 8], strides = [1, 1, 1]} : vector<4x16x8xf32> to vector<1x16x8xf32>
    %149 = vector.shape_cast %148 : vector<1x16x8xf32> to vector<16x8xf32>
    %150 = vector.extract_strided_slice %143 {offsets = [3, 0, 0], sizes = [1, 16, 8], strides = [1, 1, 1]} : vector<4x16x8xf32> to vector<1x16x8xf32>
    %151 = vector.shape_cast %150 : vector<1x16x8xf32> to vector<16x8xf32>
    %152 = tpu.concatenate %145, %147, %149, %151 in 1 : vector<16x8xf32>, vector<16x8xf32>, vector<16x8xf32>, vector<16x8xf32> -> vector<16x32xf32>
    %153 = arith.truncf %152 : vector<16x32xf32> to vector<16x32xbf16>
    %c96 = arith.constant 96 : index
    %c0_39 = arith.constant 0 : index
    %154 = vector.load %arg2[%c96, %c0_39] : memref<448x64xbf16, #tpu.memory_space<vmem>>, vector<32x32xbf16>
    %cst_40 = arith.constant dense<0.000000e+00> : vector<16x32xf32>
    %155 = tpu.matmul %153, %154, %cst_40 {dimension_numbers = #tpu.dot_dimension_numbers<[1], [0], [0], [1], [0, 0, 1, 1], [], []>} : vector<16x32xbf16>, vector<32x32xbf16>, vector<16x32xf32> -> vector<16x32xf32>
    %c80 = arith.constant 80 : index
    %c0_41 = arith.constant 0 : index
    %156 = vector.load %arg1[%c80, %c0_41] : memref<216x64xf32, #tpu.memory_space<vmem>>, vector<1x32xf32>
    %157 = vector.broadcast %156 : vector<1x32xf32> to vector<16x32xf32>
    %158 = arith.addf %155, %157 : vector<16x32xf32>
    %159 = arith.addf %90, %158 : vector<16x32xf32>
    %c88 = arith.constant 88 : index
    %c0_42 = arith.constant 0 : index
    %160 = vector.load %arg1[%c88, %c0_42] : memref<216x64xf32, #tpu.memory_space<vmem>>, vector<1x32xf32>
    %c96_43 = arith.constant 96 : index
    %c0_44 = arith.constant 0 : index
    %161 = vector.load %arg1[%c96_43, %c0_44] : memref<216x64xf32, #tpu.memory_space<vmem>>, vector<1x32xf32>
    %cst_45 = arith.constant dense<0.000000e+00> : vector<16xf32>
    %162 = vector.multi_reduction <add>, %159, %cst_45 [1] : vector<16x32xf32> to vector<16xf32>
    %163 = vector.shape_cast %162 : vector<16xf32> to vector<16x1xf32>
    %cst_46 = arith.constant 3.200000e+01 : f32
    %164 = vector.broadcast %cst_46 : f32 to vector<16x1xf32>
    %165 = arith.divf %163, %164 : vector<16x1xf32>
    %166 = vector.broadcast %165 : vector<16x1xf32> to vector<16x32xf32>
    %167 = arith.subf %159, %166 : vector<16x32xf32>
    %168 = arith.mulf %167, %167 : vector<16x32xf32>
    %cst_47 = arith.constant dense<0.000000e+00> : vector<16xf32>
    %169 = vector.multi_reduction <add>, %168, %cst_47 [1] : vector<16x32xf32> to vector<16xf32>
    %170 = vector.shape_cast %169 : vector<16xf32> to vector<16x1xf32>
    %cst_48 = arith.constant 3.200000e+01 : f32
    %171 = vector.broadcast %cst_48 : f32 to vector<16x1xf32>
    %172 = arith.divf %170, %171 : vector<16x1xf32>
    %173 = vector.broadcast %165 : vector<16x1xf32> to vector<16x32xf32>
    %174 = arith.subf %159, %173 : vector<16x32xf32>
    %cst_49 = arith.constant 9.99999996E-13 : f32
    %175 = vector.broadcast %cst_49 : f32 to vector<16x1xf32>
    %176 = arith.addf %172, %175 : vector<16x1xf32>
    %177 = math.rsqrt %176 : vector<16x1xf32>
    %178 = vector.broadcast %177 : vector<16x1xf32> to vector<16x32xf32>
    %179 = arith.mulf %174, %178 : vector<16x32xf32>
    %180 = vector.broadcast %160 : vector<1x32xf32> to vector<16x32xf32>
    %181 = arith.mulf %179, %180 : vector<16x32xf32>
    %182 = vector.broadcast %161 : vector<1x32xf32> to vector<16x32xf32>
    %183 = arith.addf %181, %182 : vector<16x32xf32>
    %184 = arith.truncf %183 : vector<16x32xf32> to vector<16x32xbf16>
    %c128 = arith.constant 128 : index
    %c0_50 = arith.constant 0 : index
    %185 = vector.load %arg2[%c128, %c0_50] : memref<448x64xbf16, #tpu.memory_space<vmem>>, vector<32x64xbf16>
    %cst_51 = arith.constant dense<0.000000e+00> : vector<16x64xf32>
    %186 = tpu.matmul %184, %185, %cst_51 {dimension_numbers = #tpu.dot_dimension_numbers<[1], [0], [0], [1], [0, 0, 1, 1], [], []>} : vector<16x32xbf16>, vector<32x64xbf16>, vector<16x64xf32> -> vector<16x64xf32>
    %c104 = arith.constant 104 : index
    %c0_52 = arith.constant 0 : index
    %187 = vector.load %arg1[%c104, %c0_52] : memref<216x64xf32, #tpu.memory_space<vmem>>, vector<1x64xf32>
    %188 = vector.broadcast %187 : vector<1x64xf32> to vector<16x64xf32>
    %189 = arith.addf %186, %188 : vector<16x64xf32>
    %cst_53 = arith.constant 5.000000e-01 : f32
    %190 = vector.broadcast %cst_53 : f32 to vector<16x64xf32>
    %191 = arith.mulf %190, %189 : vector<16x64xf32>
    %cst_54 = arith.constant 4.471500e-02 : f32
    %192 = vector.broadcast %cst_54 : f32 to vector<16x64xf32>
    %193 = arith.mulf %192, %189 : vector<16x64xf32>
    %194 = arith.mulf %193, %189 : vector<16x64xf32>
    %195 = arith.mulf %194, %189 : vector<16x64xf32>
    %196 = arith.addf %189, %195 : vector<16x64xf32>
    %cst_55 = arith.constant 0.797884583 : f32
    %197 = vector.broadcast %cst_55 : f32 to vector<16x64xf32>
    %198 = arith.mulf %197, %196 : vector<16x64xf32>
    %199 = math.tanh %198 : vector<16x64xf32>
    %cst_56 = arith.constant 1.000000e+00 : f32
    %200 = vector.broadcast %cst_56 : f32 to vector<16x64xf32>
    %201 = arith.addf %200, %199 : vector<16x64xf32>
    %202 = arith.mulf %191, %201 : vector<16x64xf32>
    %203 = arith.truncf %202 : vector<16x64xf32> to vector<16x64xbf16>
    %c160 = arith.constant 160 : index
    %c0_57 = arith.constant 0 : index
    %204 = vector.load %arg2[%c160, %c0_57] : memref<448x64xbf16, #tpu.memory_space<vmem>>, vector<64x32xbf16>
    %cst_58 = arith.constant dense<0.000000e+00> : vector<16x32xf32>
    %205 = tpu.matmul %203, %204, %cst_58 {dimension_numbers = #tpu.dot_dimension_numbers<[1], [0], [0], [1], [0, 0, 1, 1], [], []>} : vector<16x64xbf16>, vector<64x32xbf16>, vector<16x32xf32> -> vector<16x32xf32>
    %c112 = arith.constant 112 : index
    %c0_59 = arith.constant 0 : index
    %206 = vector.load %arg1[%c112, %c0_59] : memref<216x64xf32, #tpu.memory_space<vmem>>, vector<1x32xf32>
    %207 = vector.broadcast %206 : vector<1x32xf32> to vector<16x32xf32>
    %208 = arith.addf %205, %207 : vector<16x32xf32>
    %209 = arith.addf %183, %208 : vector<16x32xf32>
    %c120 = arith.constant 120 : index
    %c0_60 = arith.constant 0 : index
    %210 = vector.load %arg1[%c120, %c0_60] : memref<216x64xf32, #tpu.memory_space<vmem>>, vector<1x32xf32>
    %c128_61 = arith.constant 128 : index
    %c0_62 = arith.constant 0 : index
    %211 = vector.load %arg1[%c128_61, %c0_62] : memref<216x64xf32, #tpu.memory_space<vmem>>, vector<1x32xf32>
    %cst_63 = arith.constant dense<0.000000e+00> : vector<16xf32>
    %212 = vector.multi_reduction <add>, %209, %cst_63 [1] : vector<16x32xf32> to vector<16xf32>
    %213 = vector.shape_cast %212 : vector<16xf32> to vector<16x1xf32>
    %cst_64 = arith.constant 3.200000e+01 : f32
    %214 = vector.broadcast %cst_64 : f32 to vector<16x1xf32>
    %215 = arith.divf %213, %214 : vector<16x1xf32>
    %216 = vector.broadcast %215 : vector<16x1xf32> to vector<16x32xf32>
    %217 = arith.subf %209, %216 : vector<16x32xf32>
    %218 = arith.mulf %217, %217 : vector<16x32xf32>
    %cst_65 = arith.constant dense<0.000000e+00> : vector<16xf32>
    %219 = vector.multi_reduction <add>, %218, %cst_65 [1] : vector<16x32xf32> to vector<16xf32>
    %220 = vector.shape_cast %219 : vector<16xf32> to vector<16x1xf32>
    %cst_66 = arith.constant 3.200000e+01 : f32
    %221 = vector.broadcast %cst_66 : f32 to vector<16x1xf32>
    %222 = arith.divf %220, %221 : vector<16x1xf32>
    %223 = vector.broadcast %215 : vector<16x1xf32> to vector<16x32xf32>
    %224 = arith.subf %209, %223 : vector<16x32xf32>
    %cst_67 = arith.constant 9.99999996E-13 : f32
    %225 = vector.broadcast %cst_67 : f32 to vector<16x1xf32>
    %226 = arith.addf %222, %225 : vector<16x1xf32>
    %227 = math.rsqrt %226 : vector<16x1xf32>
    %228 = vector.broadcast %227 : vector<16x1xf32> to vector<16x32xf32>
    %229 = arith.mulf %224, %228 : vector<16x32xf32>
    %230 = vector.broadcast %210 : vector<1x32xf32> to vector<16x32xf32>
    %231 = arith.mulf %229, %230 : vector<16x32xf32>
    %232 = vector.broadcast %211 : vector<1x32xf32> to vector<16x32xf32>
    %233 = arith.addf %231, %232 : vector<16x32xf32>
    %234 = arith.truncf %233 : vector<16x32xf32> to vector<16x32xbf16>
    %c224 = arith.constant 224 : index
    %c0_68 = arith.constant 0 : index
    %235 = vector.load %arg2[%c224, %c0_68] : memref<448x64xbf16, #tpu.memory_space<vmem>>, vector<32x32xbf16>
    %cst_69 = arith.constant dense<0.000000e+00> : vector<16x32xf32>
    %236 = tpu.matmul %234, %235, %cst_69 {dimension_numbers = #tpu.dot_dimension_numbers<[1], [0], [0], [1], [0, 0, 1, 1], [], []>} : vector<16x32xbf16>, vector<32x32xbf16>, vector<16x32xf32> -> vector<16x32xf32>
    %c136 = arith.constant 136 : index
    %c0_70 = arith.constant 0 : index
    %237 = vector.load %arg1[%c136, %c0_70] : memref<216x64xf32, #tpu.memory_space<vmem>>, vector<1x32xf32>
    %238 = vector.broadcast %237 : vector<1x32xf32> to vector<16x32xf32>
    %239 = arith.addf %236, %238 : vector<16x32xf32>
    %c256 = arith.constant 256 : index
    %c0_71 = arith.constant 0 : index
    %240 = vector.load %arg2[%c256, %c0_71] : memref<448x64xbf16, #tpu.memory_space<vmem>>, vector<32x32xbf16>
    %cst_72 = arith.constant dense<0.000000e+00> : vector<16x32xf32>
    %241 = tpu.matmul %234, %240, %cst_72 {dimension_numbers = #tpu.dot_dimension_numbers<[1], [0], [0], [1], [0, 0, 1, 1], [], []>} : vector<16x32xbf16>, vector<32x32xbf16>, vector<16x32xf32> -> vector<16x32xf32>
    %c144 = arith.constant 144 : index
    %c0_73 = arith.constant 0 : index
    %242 = vector.load %arg1[%c144, %c0_73] : memref<216x64xf32, #tpu.memory_space<vmem>>, vector<1x32xf32>
    %243 = vector.broadcast %242 : vector<1x32xf32> to vector<16x32xf32>
    %244 = arith.addf %241, %243 : vector<16x32xf32>
    %c288 = arith.constant 288 : index
    %c0_74 = arith.constant 0 : index
    %245 = vector.load %arg2[%c288, %c0_74] : memref<448x64xbf16, #tpu.memory_space<vmem>>, vector<32x32xbf16>
    %cst_75 = arith.constant dense<0.000000e+00> : vector<16x32xf32>
    %246 = tpu.matmul %234, %245, %cst_75 {dimension_numbers = #tpu.dot_dimension_numbers<[1], [0], [0], [1], [0, 0, 1, 1], [], []>} : vector<16x32xbf16>, vector<32x32xbf16>, vector<16x32xf32> -> vector<16x32xf32>
    %c152 = arith.constant 152 : index
    %c0_76 = arith.constant 0 : index
    %247 = vector.load %arg1[%c152, %c0_76] : memref<216x64xf32, #tpu.memory_space<vmem>>, vector<1x32xf32>
    %248 = vector.broadcast %247 : vector<1x32xf32> to vector<16x32xf32>
    %249 = arith.addf %246, %248 : vector<16x32xf32>
    %250 = vector.extract_strided_slice %239 {offsets = [0, 0], sizes = [16, 8], strides = [1, 1]} : vector<16x32xf32> to vector<16x8xf32>
    %251 = vector.extract_strided_slice %239 {offsets = [0, 8], sizes = [16, 8], strides = [1, 1]} : vector<16x32xf32> to vector<16x8xf32>
    %252 = vector.extract_strided_slice %239 {offsets = [0, 16], sizes = [16, 8], strides = [1, 1]} : vector<16x32xf32> to vector<16x8xf32>
    %253 = vector.extract_strided_slice %239 {offsets = [0, 24], sizes = [16, 8], strides = [1, 1]} : vector<16x32xf32> to vector<16x8xf32>
    %254 = tpu.concatenate %250, %251, %252, %253 in 0 : vector<16x8xf32>, vector<16x8xf32>, vector<16x8xf32>, vector<16x8xf32> -> vector<64x8xf32>
    %255 = vector.shape_cast %254 : vector<64x8xf32> to vector<8x8x8xf32>
    %256 = arith.truncf %255 : vector<8x8x8xf32> to vector<8x8x8xbf16>
    %257 = vector.extract_strided_slice %244 {offsets = [0, 0], sizes = [16, 8], strides = [1, 1]} : vector<16x32xf32> to vector<16x8xf32>
    %258 = vector.extract_strided_slice %244 {offsets = [0, 8], sizes = [16, 8], strides = [1, 1]} : vector<16x32xf32> to vector<16x8xf32>
    %259 = vector.extract_strided_slice %244 {offsets = [0, 16], sizes = [16, 8], strides = [1, 1]} : vector<16x32xf32> to vector<16x8xf32>
    %260 = vector.extract_strided_slice %244 {offsets = [0, 24], sizes = [16, 8], strides = [1, 1]} : vector<16x32xf32> to vector<16x8xf32>
    %261 = tpu.concatenate %257, %258, %259, %260 in 0 : vector<16x8xf32>, vector<16x8xf32>, vector<16x8xf32>, vector<16x8xf32> -> vector<64x8xf32>
    %262 = vector.shape_cast %261 : vector<64x8xf32> to vector<8x8x8xf32>
    %263 = arith.truncf %262 : vector<8x8x8xf32> to vector<8x8x8xbf16>
    %264 = vector.extract_strided_slice %249 {offsets = [0, 0], sizes = [16, 8], strides = [1, 1]} : vector<16x32xf32> to vector<16x8xf32>
    %265 = vector.extract_strided_slice %249 {offsets = [0, 8], sizes = [16, 8], strides = [1, 1]} : vector<16x32xf32> to vector<16x8xf32>
    %266 = vector.extract_strided_slice %249 {offsets = [0, 16], sizes = [16, 8], strides = [1, 1]} : vector<16x32xf32> to vector<16x8xf32>
    %267 = vector.extract_strided_slice %249 {offsets = [0, 24], sizes = [16, 8], strides = [1, 1]} : vector<16x32xf32> to vector<16x8xf32>
    %268 = tpu.concatenate %264, %265, %266, %267 in 0 : vector<16x8xf32>, vector<16x8xf32>, vector<16x8xf32>, vector<16x8xf32> -> vector<64x8xf32>
    %269 = vector.shape_cast %268 : vector<64x8xf32> to vector<8x8x8xf32>
    %270 = arith.truncf %269 : vector<8x8x8xf32> to vector<8x8x8xbf16>
    "tpu.trace_start"() <{level = 10 : i32, message = "bqd,bkd->bqk"}> : () -> ()
    %cst_77 = arith.constant dense<0.000000e+00> : vector<8x8x8xf32>
    %271 = tpu.matmul %256, %263, %cst_77 {dimension_numbers = #tpu.dot_dimension_numbers<[2], [2], [1], [1], [0, 0, 0, 1, 1, 1], [0], [0]>} : vector<8x8x8xbf16>, vector<8x8x8xbf16>, vector<8x8x8xf32> -> vector<8x8x8xf32>
    "tpu.trace_stop"() : () -> ()
    %cst_78 = arith.constant 0.353553385 : f32
    %272 = vector.broadcast %cst_78 : f32 to vector<8x8x8xf32>
    %273 = arith.mulf %271, %272 : vector<8x8x8xf32>
    %cst_79 = arith.constant dense<0xFF800000> : vector<8x8xf32>
    %274 = vector.multi_reduction <maximumf>, %273, %cst_79 [2] : vector<8x8x8xf32> to vector<8x8xf32>
    %275 = vector.shape_cast %274 : vector<8x8xf32> to vector<8x8x1xf32>
    %276 = vector.broadcast %275 : vector<8x8x1xf32> to vector<8x8x8xf32>
    %277 = arith.subf %273, %276 : vector<8x8x8xf32>
    %278 = math.exp %277 : vector<8x8x8xf32>
    %cst_80 = arith.constant dense<0.000000e+00> : vector<8x8xf32>
    %279 = vector.multi_reduction <add>, %278, %cst_80 [2] : vector<8x8x8xf32> to vector<8x8xf32>
    %280 = vector.shape_cast %279 : vector<8x8xf32> to vector<8x8x1xf32>
    %281 = tpu.reciprocal %280 {approx = true} : vector<8x8x1xf32> -> vector<8x8x1xf32>
    %282 = vector.broadcast %281 : vector<8x8x1xf32> to vector<8x8x8xf32>
    %283 = arith.mulf %278, %282 : vector<8x8x8xf32>
    %284 = arith.truncf %283 : vector<8x8x8xf32> to vector<8x8x8xbf16>
    "tpu.trace_start"() <{level = 10 : i32, message = "bqk,bkd->bqd"}> : () -> ()
    %cst_81 = arith.constant dense<0.000000e+00> : vector<8x8x8xf32>
    %285 = tpu.matmul %284, %270, %cst_81 {dimension_numbers = #tpu.dot_dimension_numbers<[2], [1], [1], [2], [0, 0, 0, 1, 1, 2], [0], [0]>} : vector<8x8x8xbf16>, vector<8x8x8xbf16>, vector<8x8x8xf32> -> vector<8x8x8xf32>
    "tpu.trace_stop"() : () -> ()
    %286 = vector.shape_cast %285 : vector<8x8x8xf32> to vector<4x16x8xf32>
    %287 = vector.extract_strided_slice %286 {offsets = [0, 0, 0], sizes = [1, 16, 8], strides = [1, 1, 1]} : vector<4x16x8xf32> to vector<1x16x8xf32>
    %288 = vector.shape_cast %287 : vector<1x16x8xf32> to vector<16x8xf32>
    %289 = vector.extract_strided_slice %286 {offsets = [1, 0, 0], sizes = [1, 16, 8], strides = [1, 1, 1]} : vector<4x16x8xf32> to vector<1x16x8xf32>
    %290 = vector.shape_cast %289 : vector<1x16x8xf32> to vector<16x8xf32>
    %291 = vector.extract_strided_slice %286 {offsets = [2, 0, 0], sizes = [1, 16, 8], strides = [1, 1, 1]} : vector<4x16x8xf32> to vector<1x16x8xf32>
    %292 = vector.shape_cast %291 : vector<1x16x8xf32> to vector<16x8xf32>
    %293 = vector.extract_strided_slice %286 {offsets = [3, 0, 0], sizes = [1, 16, 8], strides = [1, 1, 1]} : vector<4x16x8xf32> to vector<1x16x8xf32>
    %294 = vector.shape_cast %293 : vector<1x16x8xf32> to vector<16x8xf32>
    %295 = tpu.concatenate %288, %290, %292, %294 in 1 : vector<16x8xf32>, vector<16x8xf32>, vector<16x8xf32>, vector<16x8xf32> -> vector<16x32xf32>
    %296 = arith.truncf %295 : vector<16x32xf32> to vector<16x32xbf16>
    %c320 = arith.constant 320 : index
    %c0_82 = arith.constant 0 : index
    %297 = vector.load %arg2[%c320, %c0_82] : memref<448x64xbf16, #tpu.memory_space<vmem>>, vector<32x32xbf16>
    %cst_83 = arith.constant dense<0.000000e+00> : vector<16x32xf32>
    %298 = tpu.matmul %296, %297, %cst_83 {dimension_numbers = #tpu.dot_dimension_numbers<[1], [0], [0], [1], [0, 0, 1, 1], [], []>} : vector<16x32xbf16>, vector<32x32xbf16>, vector<16x32xf32> -> vector<16x32xf32>
    %c160_84 = arith.constant 160 : index
    %c0_85 = arith.constant 0 : index
    %299 = vector.load %arg1[%c160_84, %c0_85] : memref<216x64xf32, #tpu.memory_space<vmem>>, vector<1x32xf32>
    %300 = vector.broadcast %299 : vector<1x32xf32> to vector<16x32xf32>
    %301 = arith.addf %298, %300 : vector<16x32xf32>
    %302 = arith.addf %233, %301 : vector<16x32xf32>
    %c168 = arith.constant 168 : index
    %c0_86 = arith.constant 0 : index
    %303 = vector.load %arg1[%c168, %c0_86] : memref<216x64xf32, #tpu.memory_space<vmem>>, vector<1x32xf32>
    %c176 = arith.constant 176 : index
    %c0_87 = arith.constant 0 : index
    %304 = vector.load %arg1[%c176, %c0_87] : memref<216x64xf32, #tpu.memory_space<vmem>>, vector<1x32xf32>
    %cst_88 = arith.constant dense<0.000000e+00> : vector<16xf32>
    %305 = vector.multi_reduction <add>, %302, %cst_88 [1] : vector<16x32xf32> to vector<16xf32>
    %306 = vector.shape_cast %305 : vector<16xf32> to vector<16x1xf32>
    %cst_89 = arith.constant 3.200000e+01 : f32
    %307 = vector.broadcast %cst_89 : f32 to vector<16x1xf32>
    %308 = arith.divf %306, %307 : vector<16x1xf32>
    %309 = vector.broadcast %308 : vector<16x1xf32> to vector<16x32xf32>
    %310 = arith.subf %302, %309 : vector<16x32xf32>
    %311 = arith.mulf %310, %310 : vector<16x32xf32>
    %cst_90 = arith.constant dense<0.000000e+00> : vector<16xf32>
    %312 = vector.multi_reduction <add>, %311, %cst_90 [1] : vector<16x32xf32> to vector<16xf32>
    %313 = vector.shape_cast %312 : vector<16xf32> to vector<16x1xf32>
    %cst_91 = arith.constant 3.200000e+01 : f32
    %314 = vector.broadcast %cst_91 : f32 to vector<16x1xf32>
    %315 = arith.divf %313, %314 : vector<16x1xf32>
    %316 = vector.broadcast %308 : vector<16x1xf32> to vector<16x32xf32>
    %317 = arith.subf %302, %316 : vector<16x32xf32>
    %cst_92 = arith.constant 9.99999996E-13 : f32
    %318 = vector.broadcast %cst_92 : f32 to vector<16x1xf32>
    %319 = arith.addf %315, %318 : vector<16x1xf32>
    %320 = math.rsqrt %319 : vector<16x1xf32>
    %321 = vector.broadcast %320 : vector<16x1xf32> to vector<16x32xf32>
    %322 = arith.mulf %317, %321 : vector<16x32xf32>
    %323 = vector.broadcast %303 : vector<1x32xf32> to vector<16x32xf32>
    %324 = arith.mulf %322, %323 : vector<16x32xf32>
    %325 = vector.broadcast %304 : vector<1x32xf32> to vector<16x32xf32>
    %326 = arith.addf %324, %325 : vector<16x32xf32>
    %327 = arith.truncf %326 : vector<16x32xf32> to vector<16x32xbf16>
    %c352 = arith.constant 352 : index
    %c0_93 = arith.constant 0 : index
    %328 = vector.load %arg2[%c352, %c0_93] : memref<448x64xbf16, #tpu.memory_space<vmem>>, vector<32x64xbf16>
    %cst_94 = arith.constant dense<0.000000e+00> : vector<16x64xf32>
    %329 = tpu.matmul %327, %328, %cst_94 {dimension_numbers = #tpu.dot_dimension_numbers<[1], [0], [0], [1], [0, 0, 1, 1], [], []>} : vector<16x32xbf16>, vector<32x64xbf16>, vector<16x64xf32> -> vector<16x64xf32>
    %c184 = arith.constant 184 : index
    %c0_95 = arith.constant 0 : index
    %330 = vector.load %arg1[%c184, %c0_95] : memref<216x64xf32, #tpu.memory_space<vmem>>, vector<1x64xf32>
    %331 = vector.broadcast %330 : vector<1x64xf32> to vector<16x64xf32>
    %332 = arith.addf %329, %331 : vector<16x64xf32>
    %cst_96 = arith.constant 5.000000e-01 : f32
    %333 = vector.broadcast %cst_96 : f32 to vector<16x64xf32>
    %334 = arith.mulf %333, %332 : vector<16x64xf32>
    %cst_97 = arith.constant 4.471500e-02 : f32
    %335 = vector.broadcast %cst_97 : f32 to vector<16x64xf32>
    %336 = arith.mulf %335, %332 : vector<16x64xf32>
    %337 = arith.mulf %336, %332 : vector<16x64xf32>
    %338 = arith.mulf %337, %332 : vector<16x64xf32>
    %339 = arith.addf %332, %338 : vector<16x64xf32>
    %cst_98 = arith.constant 0.797884583 : f32
    %340 = vector.broadcast %cst_98 : f32 to vector<16x64xf32>
    %341 = arith.mulf %340, %339 : vector<16x64xf32>
    %342 = math.tanh %341 : vector<16x64xf32>
    %cst_99 = arith.constant 1.000000e+00 : f32
    %343 = vector.broadcast %cst_99 : f32 to vector<16x64xf32>
    %344 = arith.addf %343, %342 : vector<16x64xf32>
    %345 = arith.mulf %334, %344 : vector<16x64xf32>
    %346 = arith.truncf %345 : vector<16x64xf32> to vector<16x64xbf16>
    %c384 = arith.constant 384 : index
    %c0_100 = arith.constant 0 : index
    %347 = vector.load %arg2[%c384, %c0_100] : memref<448x64xbf16, #tpu.memory_space<vmem>>, vector<64x32xbf16>
    %cst_101 = arith.constant dense<0.000000e+00> : vector<16x32xf32>
    %348 = tpu.matmul %346, %347, %cst_101 {dimension_numbers = #tpu.dot_dimension_numbers<[1], [0], [0], [1], [0, 0, 1, 1], [], []>} : vector<16x64xbf16>, vector<64x32xbf16>, vector<16x32xf32> -> vector<16x32xf32>
    %c192 = arith.constant 192 : index
    %c0_102 = arith.constant 0 : index
    %349 = vector.load %arg1[%c192, %c0_102] : memref<216x64xf32, #tpu.memory_space<vmem>>, vector<1x32xf32>
    %350 = vector.broadcast %349 : vector<1x32xf32> to vector<16x32xf32>
    %351 = arith.addf %348, %350 : vector<16x32xf32>
    %352 = arith.addf %326, %351 : vector<16x32xf32>
    %c200 = arith.constant 200 : index
    %c0_103 = arith.constant 0 : index
    %353 = vector.load %arg1[%c200, %c0_103] : memref<216x64xf32, #tpu.memory_space<vmem>>, vector<1x32xf32>
    %c208 = arith.constant 208 : index
    %c0_104 = arith.constant 0 : index
    %354 = vector.load %arg1[%c208, %c0_104] : memref<216x64xf32, #tpu.memory_space<vmem>>, vector<1x32xf32>
    %cst_105 = arith.constant dense<0.000000e+00> : vector<16xf32>
    %355 = vector.multi_reduction <add>, %352, %cst_105 [1] : vector<16x32xf32> to vector<16xf32>
    %356 = vector.shape_cast %355 : vector<16xf32> to vector<16x1xf32>
    %cst_106 = arith.constant 3.200000e+01 : f32
    %357 = vector.broadcast %cst_106 : f32 to vector<16x1xf32>
    %358 = arith.divf %356, %357 : vector<16x1xf32>
    %359 = vector.broadcast %358 : vector<16x1xf32> to vector<16x32xf32>
    %360 = arith.subf %352, %359 : vector<16x32xf32>
    %361 = arith.mulf %360, %360 : vector<16x32xf32>
    %cst_107 = arith.constant dense<0.000000e+00> : vector<16xf32>
    %362 = vector.multi_reduction <add>, %361, %cst_107 [1] : vector<16x32xf32> to vector<16xf32>
    %363 = vector.shape_cast %362 : vector<16xf32> to vector<16x1xf32>
    %cst_108 = arith.constant 3.200000e+01 : f32
    %364 = vector.broadcast %cst_108 : f32 to vector<16x1xf32>
    %365 = arith.divf %363, %364 : vector<16x1xf32>
    %366 = vector.broadcast %358 : vector<16x1xf32> to vector<16x32xf32>
    %367 = arith.subf %352, %366 : vector<16x32xf32>
    %cst_109 = arith.constant 9.99999996E-13 : f32
    %368 = vector.broadcast %cst_109 : f32 to vector<16x1xf32>
    %369 = arith.addf %365, %368 : vector<16x1xf32>
    %370 = math.rsqrt %369 : vector<16x1xf32>
    %371 = vector.broadcast %370 : vector<16x1xf32> to vector<16x32xf32>
    %372 = arith.mulf %367, %371 : vector<16x32xf32>
    %373 = vector.broadcast %353 : vector<1x32xf32> to vector<16x32xf32>
    %374 = arith.mulf %372, %373 : vector<16x32xf32>
    %375 = vector.broadcast %354 : vector<1x32xf32> to vector<16x32xf32>
    %376 = arith.addf %374, %375 : vector<16x32xf32>
    %377 = vector.shape_cast %376 : vector<16x32xf32> to vector<2x8x32xf32>
    %378 = vector.extract_strided_slice %377 {offsets = [0, 0, 0], sizes = [2, 1, 32], strides = [1, 1, 1]} : vector<2x8x32xf32> to vector<2x1x32xf32>
    %379 = vector.shape_cast %378 : vector<2x1x32xf32> to vector<2x32xf32>
    %c0_110 = arith.constant 0 : index
    %c0_111 = arith.constant 0 : index
    %380 = vector.load %arg3[%c0_110, %c0_111] : memref<2x32xf32, #tpu.memory_space<vmem>>, vector<2x32xf32>
    tpu.vector_store %arg3[%c0_110, %c0_111], %379 {strides = array<i32>} : memref<2x32xf32, #tpu.memory_space<vmem>>, vector<2x32xf32>,
    return
  }
}

</mosaic_0001>

<bundles_post_ra>
// kernel: _lambda_.1
= control target key start
LH: loop header
LB: loop body
LE: loop exit
PB: predicated region body
PF: predicated region fallthrough
CT: control target
= control target key end

     0   :  { %vm31_vm0 = vcmask 1045504   ;;  %vm24_vm1 = vcmask 48128   ;;  %v4062_v3 = vmov 6   ;;  %v4063_v4 = vmov 0.0   ;;  %s4691_s0 = inlined_call_operand.vmem [shape: f32[16,7], index: 0, kind: input, shape index: {}]   ;;  %s4692_s1 = inlined_call_operand.vmem [shape: f32[216,64], index: 1, kind: input, shape index: {}]   ;;  %s4693_s2 = inlined_call_operand.vmem [shape: bf16[448,64], index: 2, kind: input, shape index: {}]   ;;  %s4694_s3 = inlined_call_operand.hbm [shape: f32[2,32], index: 3, kind: output, shape index: {}]  }
   0x1   :  { %v18_v0 = vld [vmem:[%s4692_s1] sm:$0x3f]  ;;  %v17_v2 = vld [vmem:[%s4691_s0 + $0x8] sm:$0xff]  ;;  %3776 = vset.pattern.permute.xlu0 %v4062_v3  ;;  %3787 = vset.pattern.permute.xlu1 %v4062_v3 }
   0x2   :  { %v16_v1 = vld [vmem:[%s4691_s0] sm:$0xff]  ;;  %3465 = vmatprep.subr.msk.mxu0 %vm31_vm0, %v18_v0  ;;  %vm111_vm3 = vcmp.eq.f32.partialorder %v17_v2, 2.0  ;;  %vm117_vm5 = vcmp.eq.f32.partialorder %v17_v2, 1.0  ;;  %vm123_vm7 = vcmp.eq.f32.partialorder %v17_v2, 3.0  ;;  %3486 = vmatprep.subr.bf16.mxu1 %v4063_v4  ;;  %vm129_vm9 = vcmp.eq.f32.partialorder %v17_v2, 4.0 }
   0x3   :  { %3467 = vmatprep.mubr.msk.f32.mxu0 %vm24_vm1, %v16_v1  ;;  %vm110_vm2 = vcmp.eq.f32.partialorder %v16_v1, 2.0  ;;  %3466 = vmatpush3.msk.msra.mxu0 %vm31_vm0, %v18_v0  ;;  %v3255_v6 = vsel %vm111_vm3, 1.0, %v4063_v4  ;;  %vm116_vm4 = vcmp.eq.f32.partialorder %v16_v1, 1.0  ;;  %v3257_v8 = vsel %vm117_vm5, 1.0, %v4063_v4 }
   0x4   :  { %v3254_v5 = vsel %vm110_vm2, 1.0, %v4063_v4  ;;  %3468 = vmatmul.mubr.msk.f32.vlgmr.msra.gmra.mrb[0].mxu0 %vm24_vm1, %v17_v2  ;;  %v3256_v7 = vsel %vm116_vm4, 1.0, %v4063_v4  ;;  %vm122_vm6 = vcmp.eq.f32.partialorder %v16_v1, 3.0  ;;  %v141_v10 = vadd.f32 %v3257_v8, %v3255_v6  ;;  %3470 = vmatprep.subr.bf16.mxu0 %v4063_v4 }
   0x5   :  { %v3777_v9 = vpack.i.bf16 %v3255_v6, %v3254_v5  ;;  %v140_v11 = vadd.f32 %v3256_v7, %v3254_v5  ;;  %v3258_v12 = vsel %vm122_vm6, 1.0, %v4063_v4  ;;  %v3259_v13 = vsel %vm123_vm7, 1.0, %v4063_v4 }
   0x6   :  { %v3782_v14 = vpack.i.bf16 %v3257_v8, %v3256_v7  ;;  %vm128_vm8 = vcmp.eq.f32.partialorder %v16_v1, 4.0  ;;  %v143_v15 = vadd.f32 %v3259_v13, %v141_v10  ;;  %v3788_v16 = vpack.i.bf16 %v3259_v13, %v3258_v12 }
   0x7   :  { %3778 = vperm.xlu0 %3776, %v3777_v9   ;;  %v142_v17 = vadd.f32 %v3258_v12, %v140_v11  ;;  %v3260_v18 = vsel %vm128_vm8, 1.0, %v4063_v4  ;;  %v3261_v19 = vsel %vm129_vm9, 1.0, %v4063_v4  ;;  %vm135_vm10 = vcmp.eq.f32.partialorder %v17_v2, 0.0 }
   0x8   :  { %vm134_vm11 = vcmp.eq.f32.partialorder %v16_v1, 0.0  ;;  %3789 = vperm.xlu1 %3787, %v3788_v16   ;;  %v145_v20 = vadd.f32 %v3261_v19, %v143_v15  ;;  %v3793_v21 = vpack.i.bf16 %v3261_v19, %v3260_v18  ;;  %v3263_v23 = vsel %vm135_vm10, 1.0, %v4063_v4 }
   0x9   :  { %v144_v22 = vadd.f32 %v3260_v18, %v142_v17  ;;  %v3262_v24 = vsel %vm134_vm11, 1.0, %v4063_v4  ;;  %v153_v32 = vsub.f32 1.0, %v3263_v23 }
   0xa   :  { %v147_v25 = vadd.f32 %v3263_v23, %v145_v20  ;;  %v152_v31 = vsub.f32 1.0, %v3262_v24 }
   0xb   :  { %3783 = vperm.xlu0 %3776, %v3782_v14   ;;  %v146_v26 = vadd.f32 %v3262_v24, %v144_v22 }
   0xc   :  { %3794 = vperm.xlu1 %3787, %v3793_v21   ;;  %v149_v27 = vmin.f32 %v147_v25, 1.0 }
   0xd   :  { %v148_v28 = vmin.f32 %v146_v26, 1.0 }
   0xe   :  { %v151_v29 = vsub.f32 1.0, %v149_v27 }
   0xf   :  { %v150_v30 = vsub.f32 1.0, %v148_v28 }
  0x10   :  { %214 = vperm.xlu0 %3776, %v151_v29  }
  0x11   :  { %209 = vperm.xlu1 %3787, %v150_v30  }
  0x14   :  { %245 = vperm.xlu0 %3776, %v152_v31  }
  0x15   :  { %250 = vperm.xlu1 %3787, %v153_v32  }
  0x16   :  { %8 = vsyncpa [#allocation3], 0  ;;  %v165_v33 = vlaneseq  ;;  %v154_v38 = vld [vmem:[%s4692_s1 + $0x8] sm:$0x1f]  ;;  %v3250_v9 = vld [vmem:[%s4692_s1 + $0x20] ss:$0 sm:$0xff] }
  0x17   :  { %v258_v24 = vld [vmem:[%s4692_s1 + $0x18] sm:$0xff]  ;;  %v257_v26 = vld [vmem:[%s4692_s1 + $0x10] sm:$0xff]  ;;  %vm263_vm12 = vcmask 261120   ;;  %vm4064_vm13 = vmmov 0   ;;  %s4065_s19 = smov 120   ;;  %vm577_vm14 = vcmask 64512  }
  0x18   :  { %v166_v34 = vshrl.u32 %v165_v33, 7  ;;  %3474 = vmatprep.mubr.msk.bf16.mxu0 %vm4064_vm13, %v4063_v4  ;;  %3490 = vmatprep.mubr.msk.bf16.mxu1 %vm4064_vm13, %v4063_v4  ;;  %s4066_s20 = smov 104   ;;  %s4067_s21 = smov 112   ;;  %vm1053_vm15 = vcmask 1043456   ;;  %vm1445_vm0 = vcmask 130048   ;;  %vm1448_vm1 = vcmask 195584  }
  0x19   :  { %s4068_s24 = smov 8   ;;  %s4069_s27 = smov 16   ;;  %vm1681_vm2 = vcmask 523264   ;;  %vm3231_vm3 = vcmask 1041409   ;;  %vm3234_vm4 = vcmask 254976  }
  0x1a   :  { %v167_v36 = vsub.s32 0, %v166_v34  ;;  %v183_v37 = vsub.s32 1, %v166_v34  ;;  %v201_v39 = vsub.s32 2, %v166_v34  ;;  %v219_v52 = vsub.s32 3, %v166_v34  ;;  %s4070_s28 = smov 24  }
  0x1b   :  { %v237_v59 = vsub.s32 4, %v166_v34 }
  0x1c   :  { %v168_v41 = vrot.slane %v154_v38, %v167_v36  ;;  %v184_v44 = vrot.slane %v154_v38, %v183_v37  ;;  %v202_v48 = vrot.slane %v154_v38, %v201_v39  ;;  %v220_v60 = vrot.slane %v154_v38, %v219_v52 }
  0x1d   :  { %v238_v0 = vrot.slane %v154_v38, %v237_v59 }
  0x86   :  { %v3779_v35 = vpop.permute.xlu0 %3778 }
  0x87   :  { %v3781_v42 = vunpack.i.h.bf16 %v3779_v35  ;;  %v3790_v43 = vpop.permute.xlu1 %3789  ;;  %v3780_v46 = vunpack.i.l.bf16 %v3779_v35 }
  0x88   :  { %v3792_v50 = vunpack.i.h.bf16 %v3790_v43  ;;  %v3791_v54 = vunpack.i.l.bf16 %v3790_v43  ;;  %v3919_v43 = vld [vmem:[%s4693_s2 + $0x20] sm:$0xff]  }
  0x89   :  { %v170_v49 = vmul.f32 %v3781_v42, %v168_v41  ;;  %v169_v53 = vmul.f32 %v3780_v46, %v168_v41  ;;  %v3918_v42 = vld [vmem:[%s4693_s2] sm:$0xff]   ;;  %3487 = vmatpush3.bf16.msra.mxu1 %v3919_v43 }
  0x8a   :  { %v3784_v40 = vpop.permute.xlu0 %3783  ;;  %v204_v57 = vmul.f32 %v3792_v50, %v202_v48  ;;  %v203_v61 = vmul.f32 %v3791_v54, %v202_v48  ;;  %3471 = vmatpush3.bf16.msra.mxu0 %v3918_v42  ;;  %3488 = vmatprep.subr.bf16.mxu1 %v4063_v4  ;;  %v3264_v54 = vld [vmem:[%s4692_s1 + $0x28] ss:$0 sm:$0xff] }
  0x8b   :  { %v3786_v45 = vunpack.i.h.bf16 %v3784_v40  ;;  %v3785_v47 = vunpack.i.l.bf16 %v3784_v40  ;;  %v3795_v56 = vpop.permute.xlu1 %3794  ;;  %3472 = vmatprep.subr.bf16.mxu0 %v4063_v4 }
  0x8c   :  { %v3797_v1 = vunpack.i.h.bf16 %v3795_v56  ;;  %v3796_v6 = vunpack.i.l.bf16 %v3795_v56 }
  0x8d   :  { %v186_v51 = vmul.f32 %v3786_v45, %v184_v44  ;;  %v185_v55 = vmul.f32 %v3785_v47, %v184_v44  ;;  %v3920_v44 = vld [vmem:[%s4693_s2 + $0x8] sm:$0xff]  }
  0x8e   :  { %v240_v10 = vmul.f32 %v3797_v1, %v238_v0  ;;  %v239_v12 = vmul.f32 %v3796_v6, %v238_v0  ;;  %v3921_v45 = vld [vmem:[%s4693_s2 + $0x28] sm:$0xff]   ;;  %3473 = vmatpush3.bf16.msra.mxu0 %v3920_v44  ;;  %v3923_v0 = vld [vmem:[%s4693_s2 + $0x18] sm:$0xff]  }
  0x8f   :  { %v188_v58 = vadd.f32 %v186_v51, %v170_v49  ;;  %v187_v62 = vadd.f32 %v185_v55, %v169_v53  ;;  %v215_v63 = vpop.permute.xlu0 %214  ;;  %3489 = vmatpush3.bf16.msra.mxu1 %v3921_v45  ;;  %3478 = vmatprep.subr.bf16.mxu0 %v4063_v4  ;;  %v3266_v1 = vld [vmem:[%s4692_s1 + $0x38] ss:$0 sm:$0xff] }
  0x90   :  { %v222_v3 = vmul.f32 %v220_v60, %v215_v63  ;;  %v210_v5 = vpop.permute.xlu1 %209  ;;  %3500 = vmatprep.subr.bf16.mxu1 %v4063_v4 }
  0x91   :  { %v206_v2 = vadd.f32 %v204_v57, %v188_v58  ;;  %v205_v7 = vadd.f32 %v203_v61, %v187_v62  ;;  %v221_v8 = vmul.f32 %v220_v60, %v210_v5  ;;  %v3265_v58 = vld [vmem:[%s4692_s1 + $0x30] ss:$0 sm:$0xff]  ;;  %v3274_v5 = vld [vmem:[%s4692_s1 + $0x48] ss:$0 sm:$0xff] }
  0x92   :  { %v3922_v62 = vld [vmem:[%s4693_s2 + $0x10] sm:$0xff]  }
  0x93   :  { %v224_v11 = vadd.f32 %v222_v3, %v206_v2  ;;  %v223_v13 = vadd.f32 %v221_v8, %v205_v7  ;;  %v246_v20 = vpop.permute.xlu0 %245 }
  0x94   :  { %v251_v17 = vpop.permute.xlu1 %250 }
  0x95   :  { %v242_v19 = vadd.f32 %v240_v10, %v224_v11  ;;  %v241_v22 = vadd.f32 %v239_v12, %v223_v13 }
  0xd7   :  { %v3469_v14 = vpop.f32.mrb[0].mxu0 }
  0xd8   :  { %v107_v15 = vadd.f32 %v3469_v14, %v3250_v9  ;;  %v101_v16 = vpop.f32.mrb[1].mxu0 }
  0xd9   :  { %v102_v18 = vadd.f32 %v3250_v9, %v101_v16 }
  0xda   :  { %v254_v21 = vmul.f32 %v251_v17, %v107_v15  ;;  %v3270_v17 = vld [vmem:[%s4692_s1 + $0x40] ss:$0 sm:$0xff] }
  0xdb   :  { %v253_v23 = vmul.f32 %v246_v20, %v102_v18 }
  0xdc   :  { %v256_v25 = vadd.f32 %v254_v21, %v242_v19 }
  0xdd   :  { %v255_v27 = vadd.f32 %v253_v23, %v241_v22 }
  0xde   :  { %v260_v28 = vadd.f32 %v258_v24, %v256_v25 }
  0xdf   :  { %v259_v29 = vadd.f32 %v257_v26, %v255_v27 }
  0xe0   :  { %v267_v30 = vsel %vm263_vm12, %v260_v28, 0.0 }
  0xe1   :  { %268 = vadd.xlane.f32.xlu1 %v267_v30  ;;  %v264_v31 = vsel %vm263_vm12, %v259_v29, 0.0 }
  0xe2   :  { %265 = vadd.xlane.f32.xlu0 %v264_v31 }
 0x16e   :  { %v269_v32 = vpop.xlane.xlu1 %268 }
 0x16f   :  { %v272_v33 = vmul.f32 0.03125, %v269_v32  ;;  %v266_v34 = vpop.xlane.xlu0 %265 }
 0x170   :  { %v271_v35 = vmul.f32 0.03125, %v266_v34 }
 0x171   :  { %v274_v36 = vsub.f32 %v260_v28, %v272_v33 }
 0x172   :  { %v273_v37 = vsub.f32 %v259_v29, %v271_v35 }
 0x173   :  { %v276_v40 = vmul.f32 %v274_v36, %v274_v36 }
 0x174   :  { %v275_v38 = vmul.f32 %v273_v37, %v273_v37 }
 0x175   :  { %v280_v41 = vsel %vm263_vm12, %v276_v40, 0.0 }
 0x176   :  { %v277_v39 = vsel %vm263_vm12, %v275_v38, 0.0 }
 0x177   :  { %278 = vadd.xlane.f32.xlu0 %v277_v39 }
 0x17b   :  { %281 = vadd.xlane.f32.xlu0 %v280_v41 }
 0x204   :  { %v279_v46 = vpop.xlane.xlu0 %278 }
 0x205   :  { %v283_v47 = vmul.f32 0.03125, %v279_v46 }
 0x207   :  { %v285_v48 = vadd.f32 1e-12, %v283_v47 }
 0x208   :  { %v282_v49 = vpop.xlane.xlu0 %281 }
 0x209   :  { %3946 = vrsqrt.f32 %v285_v48  ;;  %v284_v50 = vmul.f32 0.03125, %v282_v49 }
 0x20b   :  { %v286_v51 = vadd.f32 1e-12, %v284_v50 }
 0x20d   :  { %3948 = vrsqrt.f32 %v286_v51 }
 0x213   :  { %v3947_v52 = vpop.eup %3946 }
 0x214   :  { %v289_v53 = vmul.f32 %v3947_v52, %v273_v37 }
 0x216   :  { %v295_v56 = vmul.f32 %v3264_v54, %v289_v53 }
 0x217   :  { %v3949_v55 = vpop.eup %3948 }
 0x218   :  { %v290_v57 = vmul.f32 %v3949_v55, %v274_v36  ;;  %v4155_v60 = vadd.f32 %v3265_v58, %v295_v56 }
 0x21a   :  { %v296_v59 = vmul.f32 %v3264_v54, %v290_v57 }
 0x21c   :  { %v4157_v61 = vadd.f32 %v3265_v58, %v296_v59 }
 0x21e   :  { %v303_v63 = vpack.c.bf16 %v4157_v61, %v4155_v60 }
 0x220   :  { %3475 = vmatmul.mubr.msk.bf16.vlgmr.msra.gmra.mrb[4].mxu0 %vm263_vm12, %v303_v63  ;;  %3491 = vmatmul.mubr.msk.bf16.vlgmr.msra.gmra.mrb[0].mxu1 %vm263_vm12, %v303_v63 }
 0x221   :  { %3479 = vmatpush3.bf16.msra.mxu0 %v3922_v62  ;;  %3482 = vmatprep.mubr.msk.bf16.mxu0 %vm4064_vm13, %v4063_v4 }
 0x222   :  { %3480 = vmatprep.subr.bf16.mxu0 %v4063_v4  ;;  %3502 = vmatprep.mubr.msk.bf16.mxu1 %vm4064_vm13, %v4063_v4 }
 0x225   :  { %3481 = vmatpush3.bf16.msra.mxu0 %v3923_v0 }
 0x226   :  { %3494 = vmatprep.subr.bf16.mxu0 %v4063_v4 }
 0x228   :  { %3483 = vmatmul.mubr.msk.bf16.vlgmr.msra.gmra.mrb[8].mxu0 %vm263_vm12, %v303_v63 }
 0x229   :  { %3496 = vmatprep.mubr.msk.bf16.mxu0 %vm4064_vm13, %v4063_v4 }
 0x2f3   :  { %v362_v2 = vpop.f32.mrb[4].mxu0  ;;  %v486_v3 = vpop.f32.mrb[0].mxu1 }
 0x2f4   :  { %v3476_v6 = vpop.f32.mrb[5].mxu0  ;;  %v3492_v7 = vpop.f32.mrb[1].mxu1  ;;  %v363_v10 = vadd.f32 %v3266_v1, %v362_v2  ;;  %v4186_v15 = vadd.f32 %v3274_v5, %v486_v3 }
 0x2f5   :  { %v365_v8 = vpop.f32.mrb[6].mxu0  ;;  %v489_v9 = vpop.f32.mrb[2].mxu1 }
 0x2f6   :  { %v366_v11 = vadd.f32 %v3266_v1, %v365_v8  ;;  %v4184_v12 = vadd.f32 %v3274_v5, %v489_v9  ;;  %v3477_v13 = vpop.f32.mrb[7].mxu0  ;;  %v3493_v14 = vpop.f32.mrb[3].mxu1  ;;  %v513_v30 = vpack.c.bf16 %v363_v10, %v363_v10  ;;  %v569_v5 = vpack.c.bf16 %v4186_v15, %v4186_v15 }
 0x2f8   :  { %v3803_v16 = vpack.i.bf16 %v366_v11, %v363_v10  ;;  %v4193_v18 = vpack.i.bf16 %v4184_v12, %v4186_v15  ;;  %v514_v31 = vpack.c.bf16 %v366_v11, %v366_v11  ;;  %v570_v6 = vpack.c.bf16 %v4184_v12, %v4184_v12 }
 0x2f9   :  { %v1055_v9 = vsel %vm1053_vm15, %v569_v5, 0 }
 0x2fa   :  { %3804 = vrot.lane.b32.xlu0 %v3803_v16, %s4065_s19  ;;  %v1101_v10 = vsel %vm1053_vm15, %v570_v6, 0 }
 0x2fb   :  { %v424_v19 = vpop.f32.mrb[8].mxu0 }
 0x2fc   :  { %v425_v20 = vadd.f32 %v3270_v17, %v424_v19  ;;  %v3484_v21 = vpop.f32.mrb[9].mxu0 }
 0x2fd   :  { %v427_v22 = vpop.f32.mrb[10].mxu0 }
 0x2fe   :  { %v428_v23 = vadd.f32 %v3270_v17, %v427_v22  ;;  %v3485_v24 = vpop.f32.mrb[11].mxu0  ;;  %v541_v25 = vpack.c.bf16 %v425_v20, %v425_v20 }
 0x300   :  { %v582_v26 = vsel %vm577_vm14, %v541_v25, 0  ;;  %v3818_v27 = vpack.i.bf16 %v428_v23, %v425_v20  ;;  %v542_v28 = vpack.c.bf16 %v428_v23, %v428_v23 }
 0x301   :  { %3495 = vmatpush3.bf16.xpose.msra.mxu0 %v582_v26 }
 0x302   :  { %3819 = vrot.lane.b32.xlu0 %v3818_v27, %s4066_s20  ;;  %3799 = vrot.lane.b32.xlu1 %v3818_v27, %s4065_s19  ;;  %v628_v29 = vsel %vm577_vm14, %v542_v28, 0 }
 0x303   :  { %3501 = vmatpush3.bf16.xpose.msra.mxu1 %v628_v29  ;;  %3506 = vmatprep.subr.bf16.mxu0 %v4063_v4 }
 0x304   :  { %3512 = vmatprep.subr.bf16.mxu1 %v4063_v4 }
 0x306   :  { %3809 = vrot.lane.b32.xlu1 %v3818_v27, %s4067_s21 }
 0x308   :  { %3497 = vmatmul.mubr.msk.bf16.vlgmr.msra.gmra.mrb[12].mxu0 %vm577_vm14, %v513_v30 }
 0x309   :  { %3508 = vmatprep.mubr.msk.bf16.mxu0 %vm4064_vm13, %v4063_v4 }
 0x30a   :  { %3814 = vrot.lane.b32.xlu1 %v3803_v16, %s4067_s21  ;;  %3503 = vmatmul.mubr.msk.bf16.vlgmr.msra.gmra.mrb[4].mxu1 %vm577_vm14, %v514_v31 }
 0x30b   :  { %3514 = vmatprep.mubr.msk.bf16.mxu1 %vm4064_vm13, %v4063_v4 }
 0x30e   :  { %3824 = vrot.lane.b32.xlu1 %v3803_v16, %s4066_s20 }
 0x36c   :  { %v3805_v37 = vpop.permute.xlu0 %3804 }
 0x36d   :  { %v3807_v43 = vunpack.i.h.bf16 %v3805_v37  ;;  %v3806_v44 = vunpack.i.l.bf16 %v3805_v37 }
 0x36f   :  { %v516_v48 = vpack.c.bf16 %v3807_v43, %v3807_v43  ;;  %v515_v49 = vpack.c.bf16 %v3806_v44, %v3806_v44 }
 0x374   :  { %v3800_v32 = vpop.permute.xlu1 %3799  ;;  %v3820_v47 = vpop.permute.xlu0 %3819 }
 0x375   :  { %v3802_v33 = vunpack.i.h.bf16 %v3800_v32  ;;  %v3801_v34 = vunpack.i.l.bf16 %v3800_v32  ;;  %v3822_v51 = vunpack.i.h.bf16 %v3820_v47  ;;  %v3821_v52 = vunpack.i.l.bf16 %v3820_v47 }
 0x377   :  { %v544_v35 = vpack.c.bf16 %v3802_v33, %v3802_v33  ;;  %v543_v36 = vpack.c.bf16 %v3801_v34, %v3801_v34  ;;  %v548_v57 = vpack.c.bf16 %v3822_v51, %v3822_v51  ;;  %v547_v58 = vpack.c.bf16 %v3821_v52, %v3821_v52 }
 0x378   :  { %v3810_v38 = vpop.permute.xlu1 %3809 }
 0x379   :  { %v3812_v39 = vunpack.i.h.bf16 %v3810_v38  ;;  %v3811_v40 = vunpack.i.l.bf16 %v3810_v38  ;;  %v674_v41 = vsel %vm577_vm14, %v543_v36, 0  ;;  %v720_v42 = vsel %vm577_vm14, %v544_v35, 0 }
 0x37a   :  { %3507 = vmatpush3.bf16.xpose.msra.mxu0 %v674_v41  ;;  %3513 = vmatpush3.bf16.xpose.msra.mxu1 %v720_v42  ;;  %v858_v0 = vsel %vm577_vm14, %v547_v58, 0  ;;  %v904_v1 = vsel %vm577_vm14, %v548_v57, 0 }
 0x37b   :  { %3518 = vmatprep.subr.bf16.mxu0 %v4063_v4  ;;  %3524 = vmatprep.subr.bf16.mxu1 %v4063_v4  ;;  %v546_v45 = vpack.c.bf16 %v3812_v39, %v3812_v39  ;;  %v545_v46 = vpack.c.bf16 %v3811_v40, %v3811_v40 }
 0x37c   :  { %v3815_v50 = vpop.permute.xlu1 %3814 }
 0x37d   :  { %v766_v53 = vsel %vm577_vm14, %v545_v46, 0  ;;  %v812_v54 = vsel %vm577_vm14, %v546_v45, 0  ;;  %v3817_v55 = vunpack.i.h.bf16 %v3815_v50  ;;  %v3816_v56 = vunpack.i.l.bf16 %v3815_v50 }
 0x37f   :  { %v518_v59 = vpack.c.bf16 %v3817_v55, %v3817_v55  ;;  %v517_v62 = vpack.c.bf16 %v3816_v56, %v3816_v56 }
 0x380   :  { %v3825_v63 = vpop.permute.xlu1 %3824 }
 0x381   :  { %3509 = vmatmul.mubr.msk.bf16.vlgmr.msra.gmra.mrb[16].mxu0 %vm577_vm14, %v515_v49  ;;  %3515 = vmatmul.mubr.msk.bf16.vlgmr.msra.gmra.mrb[8].mxu1 %vm577_vm14, %v516_v48  ;;  %v3827_v2 = vunpack.i.h.bf16 %v3825_v63  ;;  %v3826_v3 = vunpack.i.l.bf16 %v3825_v63 }
 0x382   :  { %3519 = vmatpush3.bf16.xpose.msra.mxu0 %v766_v53  ;;  %3525 = vmatpush3.bf16.xpose.msra.mxu1 %v812_v54 }
 0x383   :  { %3520 = vmatprep.mubr.msk.bf16.mxu0 %vm4064_vm13, %v4063_v4  ;;  %3526 = vmatprep.mubr.msk.bf16.mxu1 %vm4064_vm13, %v4063_v4  ;;  %v520_v7 = vpack.c.bf16 %v3827_v2, %v3827_v2  ;;  %v519_v8 = vpack.c.bf16 %v3826_v3, %v3826_v3 }
 0x384   :  { %3530 = vmatprep.subr.bf16.mxu0 %v4063_v4  ;;  %3536 = vmatprep.subr.bf16.mxu1 %v4063_v4 }
 0x389   :  { %3521 = vmatmul.mubr.msk.bf16.vlgmr.msra.gmra.mrb[20].mxu0 %vm577_vm14, %v517_v62  ;;  %3527 = vmatmul.mubr.msk.bf16.vlgmr.msra.gmra.mrb[12].mxu1 %vm577_vm14, %v518_v59 }
 0x38a   :  { %3531 = vmatpush3.bf16.xpose.msra.mxu0 %v858_v0  ;;  %3537 = vmatpush3.bf16.xpose.msra.mxu1 %v904_v1 }
 0x38b   :  { %3532 = vmatprep.mubr.msk.bf16.mxu0 %vm4064_vm13, %v4063_v4  ;;  %3538 = vmatprep.mubr.msk.bf16.mxu1 %vm4064_vm13, %v4063_v4 }
 0x38c   :  { %3542 = vmatprep.subr.bf16.mxu0 %v4063_v4  ;;  %3548 = vmatprep.subr.bf16.mxu1 %v4063_v4 }
 0x391   :  { %3533 = vmatmul.mubr.msk.bf16.vlgmr.msra.gmra.mrb[24].mxu0 %vm577_vm14, %v519_v8  ;;  %3539 = vmatmul.mubr.msk.bf16.vlgmr.msra.gmra.mrb[16].mxu1 %vm577_vm14, %v520_v7 }
 0x392   :  { %3543 = vmatpush3.bf16.msra.mxu0 %v1055_v9  ;;  %3549 = vmatpush3.bf16.msra.mxu1 %v1101_v10 }
 0x393   :  { %3550 = vmatprep.mubr.msk.bf16.mxu1 %vm4064_vm13, %v4063_v4  ;;  %3560 = vmatprep.subr.bf16.mxu1 %v4063_v4 }
 0x394   :  { %3544 = vmatprep.mubr.msk.bf16.mxu0 %vm4064_vm13, %v4063_v4  ;;  %3554 = vmatprep.subr.bf16.mxu0 %v4063_v4 }
 0x3db   :  { %v618_v11 = vpop.f32.mrb[12].mxu0 }
 0x3dc   :  { %v4249_v12 = vmul.f32 0.35355338, %v618_v11  ;;  %v3498_v13 = vpop.f32.mrb[13].mxu0 }
 0x3dd   :  { %v621_v14 = vpop.f32.mrb[14].mxu0  ;;  %v664_v15 = vpop.f32.mrb[4].mxu1 }
 0x3de   :  { %v947_v16 = vmul.f32 0.35355338, %v664_v15  ;;  %v3499_v17 = vpop.f32.mrb[15].mxu0  ;;  %v3504_v19 = vpop.f32.mrb[5].mxu1  ;;  %v954_v20 = vsel %vm577_vm14, %v4249_v12, -inf }
 0x3df   :  { %v667_v21 = vpop.f32.mrb[6].mxu1  ;;  %955 = vmax.xlane.f32.xlu0 %v954_v20 }
 0x3e0   :  { %v3505_v22 = vpop.f32.mrb[7].mxu1  ;;  %v957_v23 = vsel %vm577_vm14, %v947_v16, -inf }
 0x3e1   :  { %958 = vmax.xlane.f32.xlu1 %v957_v23 }
 0x454   :  { %v710_v24 = vpop.f32.mrb[16].mxu0  ;;  %v756_v25 = vpop.f32.mrb[8].mxu1 }
 0x455   :  { %v948_v26 = vmul.f32 0.35355338, %v710_v24  ;;  %v3510_v27 = vpop.f32.mrb[17].mxu0  ;;  %v3516_v28 = vpop.f32.mrb[9].mxu1  ;;  %v949_v31 = vmul.f32 0.35355338, %v756_v25 }
 0x456   :  { %v713_v29 = vpop.f32.mrb[18].mxu0  ;;  %v759_v30 = vpop.f32.mrb[10].mxu1 }
 0x457   :  { %v3511_v32 = vpop.f32.mrb[19].mxu0  ;;  %v3517_v33 = vpop.f32.mrb[11].mxu1  ;;  %v960_v34 = vsel %vm577_vm14, %v948_v26, -inf  ;;  %v963_v35 = vsel %vm577_vm14, %v949_v31, -inf }
 0x458   :  { %961 = vmax.xlane.f32.xlu0 %v960_v34 }
 0x45c   :  { %v848_v36 = vpop.f32.mrb[12].mxu1  ;;  %964 = vmax.xlane.f32.xlu0 %v963_v35  ;;  %v802_v37 = vpop.f32.mrb[20].mxu0 }
 0x45d   :  { %v951_v38 = vmul.f32 0.35355338, %v848_v36  ;;  %v950_v39 = vmul.f32 0.35355338, %v802_v37  ;;  %v3522_v40 = vpop.f32.mrb[21].mxu0  ;;  %v3528_v41 = vpop.f32.mrb[13].mxu1 }
 0x45e   :  { %v805_v42 = vpop.f32.mrb[22].mxu0  ;;  %v851_v43 = vpop.f32.mrb[14].mxu1 }
 0x45f   :  { %v3523_v44 = vpop.f32.mrb[23].mxu0  ;;  %v3529_v45 = vpop.f32.mrb[15].mxu1  ;;  %v969_v46 = vsel %vm577_vm14, %v951_v38, -inf  ;;  %v966_v47 = vsel %vm577_vm14, %v950_v39, -inf }
 0x460   :  { %970 = vmax.xlane.f32.xlu0 %v969_v46  ;;  %967 = vmax.xlane.f32.xlu1 %v966_v47 }
 0x464   :  { %v894_v48 = vpop.f32.mrb[24].mxu0  ;;  %v940_v49 = vpop.f32.mrb[16].mxu1 }
 0x465   :  { %v952_v50 = vmul.f32 0.35355338, %v894_v48  ;;  %v953_v51 = vmul.f32 0.35355338, %v940_v49  ;;  %v3534_v52 = vpop.f32.mrb[25].mxu0  ;;  %v3540_v53 = vpop.f32.mrb[17].mxu1 }
 0x466   :  { %v897_v54 = vpop.f32.mrb[26].mxu0  ;;  %v943_v55 = vpop.f32.mrb[18].mxu1 }
 0x467   :  { %v3535_v56 = vpop.f32.mrb[27].mxu0  ;;  %v3541_v57 = vpop.f32.mrb[19].mxu1  ;;  %v975_v58 = vsel %vm577_vm14, %v953_v51, -inf  ;;  %v972_v59 = vsel %vm577_vm14, %v952_v50, -inf }
 0x468   :  { %976 = vmax.xlane.f32.xlu0 %v975_v58  ;;  %973 = vmax.xlane.f32.xlu1 %v972_v59 }
 0x46c   :  { %v956_v3 = vpop.xlane.xlu0 %955 }
 0x46d   :  { %v978_v5 = vsub.f32 %v4249_v12, %v956_v3 }
 0x46e   :  { %v959_v62 = vpop.xlane.xlu1 %958 }
 0x46f   :  { %v979_v63 = vsub.f32 %v947_v16, %v959_v62  ;;  %v986_v6 = vmul.f32 1.442695, %v978_v5 }
 0x471   :  { %v988_v0 = vmul.f32 1.442695, %v979_v63 }
 0x473   :  { %3950 = vpow2.f32 %v988_v0 }
 0x474   :  { %3952 = vpow2.f32 %v986_v6 }
 0x479   :  { %3829 = vrot.lane.b32.xlu1 %v4193_v18, %s4065_s19 }
 0x47d   :  { %v3951_v1 = vpop.eup %3950 }
 0x47e   :  { %v1005_v2 = vsel %vm577_vm14, %v3951_v1, 0.0  ;;  %v4264_v7 = vpop.eup %3952 }
 0x47f   :  { %1006 = vadd.xlane.f32.xlu0 %v1005_v2  ;;  %v1002_v8 = vsel %vm577_vm14, %v4264_v7, 0.0 }
 0x49d   :  { %1003 = vadd.xlane.f32.xlu1 %v1002_v8 }
 0x4e5   :  { %v962_v9 = vpop.xlane.xlu0 %961 }
 0x4e6   :  { %v980_v10 = vsub.f32 %v948_v26, %v962_v9 }
 0x4e8   :  { %v990_v11 = vmul.f32 1.442695, %v980_v10 }
 0x4e9   :  { %v965_v13 = vpop.xlane.xlu0 %964 }
 0x4ea   :  { %3954 = vpow2.f32 %v990_v11  ;;  %v981_v14 = vsub.f32 %v949_v31, %v965_v13 }
 0x4ec   :  { %v992_v15 = vmul.f32 1.442695, %v981_v14 }
 0x4ed   :  { %v971_v16 = vpop.xlane.xlu0 %970  ;;  %v968_v17 = vpop.xlane.xlu1 %967 }
 0x4ee   :  { %3956 = vpow2.f32 %v992_v15  ;;  %v983_v19 = vsub.f32 %v951_v38, %v971_v16  ;;  %v982_v12 = vsub.f32 %v950_v39, %v968_v17 }
 0x4f0   :  { %v996_v20 = vmul.f32 1.442695, %v983_v19  ;;  %v994_v21 = vmul.f32 1.442695, %v982_v12 }
 0x4f2   :  { %3958 = vpow2.f32 %v996_v20 }
 0x4f3   :  { %3960 = vpow2.f32 %v994_v21 }
 0x4f4   :  { %v3955_v22 = vpop.eup %3954 }
 0x4f5   :  { %v977_v23 = vpop.xlane.xlu0 %976  ;;  %v974_v24 = vpop.xlane.xlu1 %973  ;;  %v1008_v25 = vsel %vm577_vm14, %v3955_v22, 0.0 }
 0x4f6   :  { %v985_v26 = vsub.f32 %v953_v51, %v977_v23  ;;  %v984_v27 = vsub.f32 %v952_v50, %v974_v24  ;;  %1009 = vadd.xlane.f32.xlu1 %v1008_v25 }
 0x4f8   :  { %v3957_v28 = vpop.eup %3956  ;;  %v1000_v29 = vmul.f32 1.442695, %v985_v26  ;;  %v998_v30 = vmul.f32 1.442695, %v984_v27 }
 0x4f9   :  { %v1011_v31 = vsel %vm577_vm14, %v3957_v28, 0.0  ;;  %v3830_v41 = vpop.permute.xlu1 %3829 }
 0x4fa   :  { %3962 = vpow2.f32 %v1000_v29  ;;  %1012 = vadd.xlane.f32.xlu0 %v1011_v31  ;;  %v3832_v42 = vunpack.i.h.bf16 %v3830_v41  ;;  %v3831_v49 = vunpack.i.l.bf16 %v3830_v41 }
 0x4fb   :  { %3964 = vpow2.f32 %v998_v30 }
 0x4fc   :  { %v4270_v32 = vpop.eup %3958  ;;  %v572_v44 = vpack.c.bf16 %v3832_v42, %v3832_v42  ;;  %v571_v51 = vpack.c.bf16 %v3831_v49, %v3831_v49 }
 0x4fd   :  { %v4272_v33 = vpop.eup %3960  ;;  %v1017_v34 = vsel %vm577_vm14, %v4270_v32, 0.0 }
 0x4fe   :  { %1018 = vadd.xlane.f32.xlu0 %v1017_v34  ;;  %v1014_v35 = vsel %vm577_vm14, %v4272_v33, 0.0  ;;  %v1193_v47 = vsel %vm1053_vm15, %v572_v44, 0 }
 0x4ff   :  { %1015 = vadd.xlane.f32.xlu1 %v1014_v35 }
 0x504   :  { %v4278_v36 = vpop.eup %3962 }
 0x505   :  { %v4280_v37 = vpop.eup %3964  ;;  %v1023_v38 = vsel %vm577_vm14, %v4278_v36, 0.0 }
 0x506   :  { %1024 = vadd.xlane.f32.xlu0 %v1023_v38  ;;  %v1020_v39 = vsel %vm577_vm14, %v4280_v37, 0.0 }
 0x507   :  { %1021 = vadd.xlane.f32.xlu1 %v1020_v39 }
 0x50c   :  { %v1007_v40 = vpop.xlane.xlu0 %1006 }
 0x50d   :  { %3966 = vrcp.f32 %v1007_v40 }
 0x517   :  { %v3967_v43 = vpop.eup %3966 }
 0x518   :  { %v1035_v45 = vmul.f32 %v3967_v43, %v3951_v1  ;;  %3839 = vrot.lane.b32.xlu1 %v4193_v18, %s4066_s20 }
 0x51a   :  { %v1043_v46 = vpack.c.bf16 %v1035_v45, %v1035_v45 }
 0x51c   :  { %3834 = vrot.lane.b32.xlu0 %v4193_v18, %s4067_s21  ;;  %3551 = vmatmul.mubr.msk.bf16.vlgmr.msra.gmra.mrb[20].mxu1 %vm577_vm14, %v1043_v46  ;;  %v1147_v18 = vsel %vm1053_vm15, %v571_v51, 0 }
 0x51d   :  { %3561 = vmatpush3.bf16.msra.mxu1 %v1193_v47  ;;  %3562 = vmatprep.mubr.msk.bf16.mxu1 %vm4064_vm13, %v4063_v4  ;;  %v3924_v47 = vld [vmem:[%s4693_s2 + $0x30] sm:$0xff]  }
 0x51e   :  { %3572 = vmatprep.subr.bf16.mxu1 %v4063_v4 }
 0x52a   :  { %v1004_v48 = vpop.xlane.xlu1 %1003 }
 0x52b   :  { %3968 = vrcp.f32 %v1004_v48 }
 0x535   :  { %v3969_v50 = vpop.eup %3968 }
 0x536   :  { %v1034_v52 = vmul.f32 %v3969_v50, %v4264_v7 }
 0x538   :  { %v1042_v53 = vpack.c.bf16 %v1034_v52, %v1034_v52  ;;  %v3925_v52 = vld [vmem:[%s4693_s2 + $0x38] sm:$0xff]  }
 0x53a   :  { %3545 = vmatmul.mubr.msk.bf16.vlgmr.msra.gmra.mrb[28].mxu0 %vm577_vm14, %v1042_v53 }
 0x53b   :  { %3555 = vmatpush3.bf16.msra.mxu0 %v1147_v18  ;;  %3556 = vmatprep.mubr.msk.bf16.mxu0 %vm4064_vm13, %v4063_v4 }
 0x53c   :  { %3566 = vmatprep.subr.bf16.mxu0 %v4063_v4 }
 0x583   :  { %v1010_v54 = vpop.xlane.xlu1 %1009 }
 0x584   :  { %3970 = vrcp.f32 %v1010_v54 }
 0x587   :  { %v1013_v55 = vpop.xlane.xlu0 %1012 }
 0x588   :  { %3972 = vrcp.f32 %v1013_v55 }
 0x58b   :  { %v1019_v56 = vpop.xlane.xlu0 %1018 }
 0x58c   :  { %3974 = vrcp.f32 %v1019_v56  ;;  %v1016_v57 = vpop.xlane.xlu1 %1015 }
 0x58d   :  { %3976 = vrcp.f32 %v1016_v57 }
 0x58e   :  { %v3971_v58 = vpop.eup %3970 }
 0x58f   :  { %v1036_v59 = vmul.f32 %v3971_v58, %v3955_v22 }
 0x591   :  { %v1044_v62 = vpack.c.bf16 %v1036_v59, %v1036_v59 }
 0x592   :  { %v3973_v63 = vpop.eup %3972 }
 0x593   :  { %v1037_v0 = vmul.f32 %v3973_v63, %v3957_v28  ;;  %v1025_v1 = vpop.xlane.xlu0 %1024  ;;  %3557 = vmatmul.mubr.msk.bf16.vlgmr.msra.gmra.mrb[32].mxu0 %vm577_vm14, %v1044_v62 }
 0x594   :  { %3978 = vrcp.f32 %v1025_v1  ;;  %v1022_v2 = vpop.xlane.xlu1 %1021  ;;  %3568 = vmatprep.mubr.msk.bf16.mxu0 %vm4064_vm13, %v4063_v4 }
 0x595   :  { %3980 = vrcp.f32 %v1022_v2  ;;  %v1045_v3 = vpack.c.bf16 %v1037_v0, %v1037_v0 }
 0x596   :  { %v3975_v5 = vpop.eup %3974 }
 0x597   :  { %v3977_v6 = vpop.eup %3976  ;;  %v3835_v7 = vpop.permute.xlu0 %3834  ;;  %3563 = vmatmul.mubr.msk.bf16.vlgmr.msra.gmra.mrb[24].mxu1 %vm577_vm14, %v1045_v3  ;;  %v1039_v14 = vmul.f32 %v3975_v5, %v4270_v32 }
 0x598   :  { %v3837_v8 = vunpack.i.h.bf16 %v3835_v7  ;;  %v3836_v9 = vunpack.i.l.bf16 %v3835_v7  ;;  %v3840_v10 = vpop.permute.xlu1 %3839  ;;  %3574 = vmatprep.mubr.msk.bf16.mxu1 %vm4064_vm13, %v4063_v4  ;;  %v1038_v15 = vmul.f32 %v3977_v6, %v4272_v33 }
 0x599   :  { %v3842_v11 = vunpack.i.h.bf16 %v3840_v10  ;;  %v3841_v13 = vunpack.i.l.bf16 %v3840_v10  ;;  %v1047_v24 = vpack.c.bf16 %v1039_v14, %v1039_v14 }
 0x59a   :  { %v574_v16 = vpack.c.bf16 %v3837_v8, %v3837_v8  ;;  %v573_v17 = vpack.c.bf16 %v3836_v9, %v3836_v9  ;;  %v1046_v23 = vpack.c.bf16 %v1038_v15, %v1038_v15 }
 0x59b   :  { %v576_v19 = vpack.c.bf16 %v3842_v11, %v3842_v11  ;;  %v575_v12 = vpack.c.bf16 %v3841_v13, %v3841_v13 }
 0x59c   :  { %v1239_v20 = vsel %vm1053_vm15, %v573_v17, 0  ;;  %v1285_v21 = vsel %vm1053_vm15, %v574_v16, 0 }
 0x59d   :  { %3567 = vmatpush3.bf16.msra.mxu0 %v1239_v20  ;;  %3573 = vmatpush3.bf16.msra.mxu1 %v1285_v21  ;;  %v1331_v26 = vsel %vm1053_vm15, %v575_v12, 0  ;;  %v1377_v27 = vsel %vm1053_vm15, %v576_v19, 0 }
 0x59e   :  { %v3979_v22 = vpop.eup %3978  ;;  %3578 = vmatprep.subr.bf16.mxu0 %v4063_v4  ;;  %3584 = vmatprep.subr.bf16.mxu1 %v4063_v4 }
 0x59f   :  { %v3981_v25 = vpop.eup %3980  ;;  %v1041_v28 = vmul.f32 %v3979_v22, %v4278_v36 }
 0x5a0   :  { %3569 = vmatmul.mubr.msk.bf16.vlgmr.msra.gmra.mrb[36].mxu0 %vm577_vm14, %v1046_v23  ;;  %3575 = vmatmul.mubr.msk.bf16.vlgmr.msra.gmra.mrb[28].mxu1 %vm577_vm14, %v1047_v24  ;;  %v1040_v29 = vmul.f32 %v3981_v25, %v4280_v37  ;;  %v3294_v24 = vld [vmem:[%s4692_s1 + $0x50] ss:$0 sm:$0xff] }
 0x5a1   :  { %3579 = vmatpush3.bf16.msra.mxu0 %v1331_v26  ;;  %3585 = vmatpush3.bf16.msra.mxu1 %v1377_v27  ;;  %v1049_v31 = vpack.c.bf16 %v1041_v28, %v1041_v28 }
 0x5a2   :  { %3580 = vmatprep.mubr.msk.bf16.mxu0 %vm4064_vm13, %v4063_v4  ;;  %3586 = vmatprep.mubr.msk.bf16.mxu1 %vm4064_vm13, %v4063_v4  ;;  %v1048_v30 = vpack.c.bf16 %v1040_v29, %v1040_v29 }
 0x5a3   :  { %3590 = vmatprep.subr.bf16.mxu0 %v4063_v4  ;;  %3598 = vmatprep.subr.bf16.mxu1 %v4063_v4 }
 0x5a8   :  { %3581 = vmatmul.mubr.msk.bf16.vlgmr.msra.gmra.mrb[40].mxu0 %vm577_vm14, %v1048_v30  ;;  %3587 = vmatmul.mubr.msk.bf16.vlgmr.msra.gmra.mrb[32].mxu1 %vm577_vm14, %v1049_v31 }
 0x5a9   :  { %3594 = vmatprep.mubr.msk.bf16.mxu0 %vm4064_vm13, %v4063_v4  ;;  %3602 = vmatprep.mubr.msk.bf16.mxu1 %vm4064_vm13, %v4063_v4 }
 0x5aa   :  { %3591 = vmatpush3.bf16.msra.mxu0 %v3924_v47 }
 0x5ab   :  { %3592 = vmatprep.subr.bf16.mxu0 %v4063_v4 }
 0x5ae   :  { %3593 = vmatpush3.bf16.msra.mxu0 %v3925_v52 }
 0x5af   :  { %3606 = vmatprep.subr.bf16.mxu0 %v4063_v4 }
 0x5ef   :  { %v1137_v32 = vpop.f32.mrb[20].mxu1 }
 0x5f0   :  { %v3552_v33 = vpop.f32.mrb[21].mxu1 }
 0x5f1   :  { %v1140_v34 = vpop.f32.mrb[22].mxu1 }
 0x5f2   :  { %v3553_v35 = vpop.f32.mrb[23].mxu1 }
 0x60d   :  { %v1091_v36 = vpop.f32.mrb[28].mxu0 }
 0x60e   :  { %v3546_v37 = vpop.f32.mrb[29].mxu0 }
 0x60f   :  { %v1094_v38 = vpop.f32.mrb[30].mxu0 }
 0x610   :  { %v3547_v39 = vpop.f32.mrb[31].mxu0 }
 0x666   :  { %v1183_v40 = vpop.f32.mrb[32].mxu0 }
 0x667   :  { %v3558_v41 = vpop.f32.mrb[33].mxu0 }
 0x668   :  { %v1186_v42 = vpop.f32.mrb[34].mxu0 }
 0x669   :  { %v3559_v43 = vpop.f32.mrb[35].mxu0 }
 0x66a   :  { %v1229_v44 = vpop.f32.mrb[24].mxu1 }
 0x66b   :  { %v3843_v45 = vpack.i.bf16 %v1229_v44, %v1183_v40  ;;  %v3564_v46 = vpop.f32.mrb[25].mxu1  ;;  %v3927_v44 = vld [vmem:[%s4693_s2 + $0x48] sm:$0xff]  }
 0x66c   :  { %v1232_v48 = vpop.f32.mrb[26].mxu1 }
 0x66d   :  { %v3565_v49 = vpop.f32.mrb[27].mxu1  ;;  %3844 = vrot.lane.b32.xlu1 %v3843_v45, %s4068_s24 }
 0x673   :  { %v1275_v50 = vpop.f32.mrb[36].mxu0  ;;  %v1321_v51 = vpop.f32.mrb[28].mxu1 }
 0x674   :  { %v3848_v53 = vpack.i.bf16 %v1321_v51, %v1275_v50  ;;  %v3570_v18 = vpop.f32.mrb[37].mxu0  ;;  %v3576_v54 = vpop.f32.mrb[29].mxu1 }
 0x675   :  { %v1278_v55 = vpop.f32.mrb[38].mxu0  ;;  %v1324_v56 = vpop.f32.mrb[30].mxu1 }
 0x676   :  { %v3577_v57 = vpop.f32.mrb[31].mxu1  ;;  %3849 = vrot.lane.b32.xlu0 %v3848_v53, %s4069_s27  ;;  %v3571_v58 = vpop.f32.mrb[39].mxu0  ;;  %v3298_v53 = vld [vmem:[%s4692_s1 + $0x58] ss:$0 sm:$0xff]  ;;  %v3299_v56 = vld [vmem:[%s4692_s1 + $0x60] ss:$0 sm:$0xff] }
 0x67b   :  { %v1367_v59 = vpop.f32.mrb[40].mxu0  ;;  %v1413_v62 = vpop.f32.mrb[32].mxu1 }
 0x67c   :  { %v3853_v63 = vpack.i.bf16 %v1413_v62, %v1367_v59  ;;  %v3582_v0 = vpop.f32.mrb[41].mxu0  ;;  %v3588_v1 = vpop.f32.mrb[33].mxu1 }
 0x67d   :  { %v1370_v2 = vpop.f32.mrb[42].mxu0  ;;  %v1416_v3 = vpop.f32.mrb[34].mxu1  ;;  %v3929_v0 = vld [vmem:[%s4693_s2 + $0x58] sm:$0xff]   ;;  %v3930_v1 = vld [vmem:[%s4693_s2 + $0x60] sm:$0xff]  }
 0x67e   :  { %v3589_v5 = vpop.f32.mrb[35].mxu1  ;;  %3854 = vrot.lane.b32.xlu1 %v3853_v63, %s4070_s28  ;;  %v3583_v6 = vpop.f32.mrb[43].mxu0  ;;  %v3928_v63 = vld [vmem:[%s4693_s2 + $0x50] sm:$0xff]   ;;  %v3931_v2 = vld [vmem:[%s4693_s2 + $0x68] sm:$0xff]  }
 0x67f   :  { %v3300_v3 = vld [vmem:[%s4692_s1 + $0x68] ss:$0 sm:$0xff] }
 0x6df   :  { %v3845_v7 = vpop.permute.xlu1 %3844 }
 0x6e0   :  { %v3847_v9 = vunpack.i.h.bf16 %v3845_v7  ;;  %v3846_v10 = vunpack.i.l.bf16 %v3845_v7 }
 0x6e2   :  { %v1444_v15 = vsel %vm577_vm14, %v1137_v32, %v3847_v9  ;;  %v1443_v16 = vsel %vm577_vm14, %v1091_v36, %v3846_v10 }
 0x6e8   :  { %v3850_v8 = vpop.permute.xlu0 %3849 }
 0x6e9   :  { %v3852_v11 = vunpack.i.h.bf16 %v3850_v8  ;;  %v3851_v13 = vunpack.i.l.bf16 %v3850_v8 }
 0x6eb   :  { %v1447_v12 = vsel %vm1445_vm0, %v1444_v15, %v3852_v11  ;;  %v1446_v20 = vsel %vm1445_vm0, %v1443_v16, %v3851_v13 }
 0x6f0   :  { %v3855_v14 = vpop.permute.xlu1 %3854 }
 0x6f1   :  { %v3857_v17 = vunpack.i.h.bf16 %v3855_v14  ;;  %v3856_v19 = vunpack.i.l.bf16 %v3855_v14 }
 0x6f3   :  { %v1450_v21 = vsel %vm1448_vm1, %v1447_v12, %v3857_v17  ;;  %v1449_v22 = vsel %vm1448_vm1, %v1446_v20, %v3856_v19 }
 0x6f4   :  { %v1451_v23 = vpack.c.bf16 %v1450_v21, %v1449_v22 }
 0x6f6   :  { %3595 = vmatmul.mubr.msk.bf16.vlgmr.msra.gmra.mrb[44].mxu0 %vm263_vm12, %v1451_v23 }
 0x6f7   :  { %3614 = vmatprep.mubr.msk.bf16.mxu0 %vm4064_vm13, %v4063_v4  ;;  %3607 = vmatpush3.bf16.msra.mxu0 %v3928_v63 }
 0x6f8   :  { %3608 = vmatprep.subr.bf16.mxu0 %v4063_v4 }
 0x6fb   :  { %3609 = vmatpush3.bf16.msra.mxu0 %v3929_v0 }
 0x6fc   :  { %3610 = vmatprep.subr.bf16.mxu0 %v4063_v4 }
 0x6ff   :  { %3611 = vmatpush3.bf16.msra.mxu0 %v3930_v1 }
 0x700   :  { %3612 = vmatprep.subr.bf16.mxu0 %v4063_v4 }
 0x703   :  { %3613 = vmatpush3.bf16.msra.mxu0 %v3931_v2 }
 0x704   :  { %3634 = vmatprep.subr.bf16.mxu0 %v4063_v4 }
 0x7c9   :  { %v1510_v25 = vpop.f32.mrb[44].mxu0 }
 0x7ca   :  { %v1511_v26 = vadd.f32 %v3294_v24, %v1510_v25  ;;  %v3596_v27 = vpop.f32.mrb[45].mxu0 }
 0x7cb   :  { %v1513_v28 = vpop.f32.mrb[46].mxu0 }
 0x7cc   :  { %v1514_v29 = vadd.f32 %v3294_v24, %v1513_v28  ;;  %v3597_v30 = vpop.f32.mrb[47].mxu0  ;;  %v1517_v31 = vadd.f32 %v1511_v26, %v4155_v60 }
 0x7ce   :  { %v1521_v32 = vsel %vm263_vm12, %v1517_v31, 0.0  ;;  %v1518_v33 = vadd.f32 %v1514_v29, %v4157_v61  ;;  %v3926_v61 = vld [vmem:[%s4693_s2 + $0x40] sm:$0xff]  }
 0x7cf   :  { %1522 = vadd.xlane.f32.xlu0 %v1521_v32  ;;  %3599 = vmatpush3.bf16.msra.mxu1 %v3926_v61 }
 0x7d0   :  { %v1524_v34 = vsel %vm263_vm12, %v1518_v33, 0.0  ;;  %3600 = vmatprep.subr.bf16.mxu1 %v4063_v4 }
 0x7d1   :  { %1525 = vadd.xlane.f32.xlu1 %v1524_v34 }
 0x7d3   :  { %3601 = vmatpush3.bf16.msra.mxu1 %v3927_v44 }
 0x7d4   :  { %3618 = vmatprep.subr.bf16.mxu1 %v4063_v4 }
 0x85c   :  { %v1523_v35 = vpop.xlane.xlu0 %1522 }
 0x85d   :  { %v1527_v36 = vmul.f32 0.03125, %v1523_v35 }
 0x85e   :  { %v1526_v37 = vpop.xlane.xlu1 %1525 }
 0x85f   :  { %v1529_v38 = vsub.f32 %v1517_v31, %v1527_v36  ;;  %v1528_v39 = vmul.f32 0.03125, %v1526_v37  ;;  %v3304_v31 = vld [vmem:[%s4692_s1 + $0x70] ss:$0 sm:$0xff] }
 0x861   :  { %v1530_v40 = vsub.f32 %v1518_v33, %v1528_v39  ;;  %v1531_v41 = vmul.f32 %v1529_v38, %v1529_v38 }
 0x863   :  { %v1533_v42 = vsel %vm263_vm12, %v1531_v41, 0.0  ;;  %v1532_v43 = vmul.f32 %v1530_v40, %v1530_v40 }
 0x864   :  { %1534 = vadd.xlane.f32.xlu0 %v1533_v42 }
 0x865   :  { %v1536_v60 = vsel %vm263_vm12, %v1532_v43, 0.0 }
 0x868   :  { %1537 = vadd.xlane.f32.xlu0 %v1536_v60 }
 0x8f1   :  { %v1535_v45 = vpop.xlane.xlu0 %1534 }
 0x8f2   :  { %v1539_v46 = vmul.f32 0.03125, %v1535_v45 }
 0x8f4   :  { %v1541_v47 = vadd.f32 1e-12, %v1539_v46 }
 0x8f5   :  { %v1538_v48 = vpop.xlane.xlu0 %1537 }
 0x8f6   :  { %3982 = vrsqrt.f32 %v1541_v47  ;;  %v1540_v49 = vmul.f32 0.03125, %v1538_v48 }
 0x8f8   :  { %v1542_v50 = vadd.f32 1e-12, %v1540_v49 }
 0x8fa   :  { %3984 = vrsqrt.f32 %v1542_v50  ;;  %v3932_v50 = vld [vmem:[%s4693_s2 + $0x70] sm:$0xff]  }
 0x900   :  { %v3983_v51 = vpop.eup %3982 }
 0x901   :  { %v1545_v52 = vmul.f32 %v3983_v51, %v1529_v38  ;;  %v3933_v51 = vld [vmem:[%s4693_s2 + $0x90] sm:$0xff]  }
 0x903   :  { %v1551_v54 = vmul.f32 %v3298_v53, %v1545_v52  ;;  %v3934_v52 = vld [vmem:[%s4693_s2 + $0x78] sm:$0xff]  }
 0x904   :  { %v3985_v18 = vpop.eup %3984 }
 0x905   :  { %v1546_v55 = vmul.f32 %v3985_v18, %v1530_v40  ;;  %v1557_v58 = vadd.f32 %v3299_v56, %v1551_v54 }
 0x907   :  { %v1552_v57 = vmul.f32 %v3298_v53, %v1546_v55  ;;  %v3935_v53 = vld [vmem:[%s4693_s2 + $0x98] sm:$0xff]  }
 0x909   :  { %v1558_v59 = vadd.f32 %v3299_v56, %v1552_v57 }
 0x90b   :  { %v1559_v62 = vpack.c.bf16 %v1558_v59, %v1557_v58 }
 0x90d   :  { %3603 = vmatmul.mubr.msk.bf16.vlgmr.msra.gmra.mrb[36].mxu1 %vm263_vm12, %v1559_v62  ;;  %v3310_v62 = vld [vmem:[%s4692_s1 + $0x78] ss:$0 sm:$0xff] }
 0x90e   :  { %3622 = vmatprep.mubr.msk.bf16.mxu1 %vm4064_vm13, %v4063_v4  ;;  %3619 = vmatpush3.bf16.msra.mxu1 %v3932_v50 }
 0x90f   :  { %3620 = vmatprep.subr.bf16.mxu1 %v4063_v4 }
 0x912   :  { %3621 = vmatpush3.bf16.msra.mxu1 %v3934_v52 }
 0x913   :  { %3626 = vmatprep.subr.bf16.mxu1 %v4063_v4 }
 0x9e0   :  { %v1618_v5 = vpop.f32.mrb[36].mxu1 }
 0x9e1   :  { %v1619_v6 = vadd.f32 %v3300_v3, %v1618_v5  ;;  %v3604_v7 = vpop.f32.mrb[37].mxu1 }
 0x9e2   :  { %v1621_v8 = vpop.f32.mrb[38].mxu1 }
 0x9e3   :  { %v1627_v9 = vmul.f32 0.044715, %v1619_v6  ;;  %v1622_v10 = vadd.f32 %v3300_v3, %v1621_v8  ;;  %v3605_v11 = vpop.f32.mrb[39].mxu1  ;;  %v1625_v25 = vmul.f32 0.5, %v1619_v6  ;;  %v3311_v3 = vld [vmem:[%s4692_s1 + $0x80] ss:$0 sm:$0xff] }
 0x9e4   :  { %v3936_v8 = vld [vmem:[%s4693_s2 + $0x80] sm:$0xff]   ;;  %v3312_v11 = vld [vmem:[%s4692_s1 + $0x88] ss:$0 sm:$0xff] }
 0x9e5   :  { %v1629_v13 = vmul.f32 %v1627_v9, %v1619_v6  ;;  %v1628_v14 = vmul.f32 0.044715, %v1622_v10  ;;  %v1626_v26 = vmul.f32 0.5, %v1622_v10 }
 0x9e7   :  { %v1631_v15 = vmul.f32 %v1629_v13, %v1619_v6  ;;  %v1630_v16 = vmul.f32 %v1628_v14, %v1622_v10 }
 0x9e9   :  { %v1633_v17 = vadd.f32 %v1631_v15, %v1619_v6  ;;  %v1632_v19 = vmul.f32 %v1630_v16, %v1622_v10  ;;  %v3320_v15 = vld [vmem:[%s4692_s1 + $0x98] ss:$0 sm:$0xff] }
 0x9eb   :  { %v1635_v12 = vmul.f32 0.7978846, %v1633_v17  ;;  %v1634_v20 = vadd.f32 %v1632_v19, %v1622_v10  ;;  %v3937_v10 = vld [vmem:[%s4693_s2 + $0x88] sm:$0xff]  }
 0x9ed   :  { %3986 = vtanh.f32 %v1635_v12  ;;  %v1636_v21 = vmul.f32 0.7978846, %v1634_v20 }
 0x9ef   :  { %3988 = vtanh.f32 %v1636_v21 }
 0x9f7   :  { %v3987_v22 = vpop.eup %3986 }
 0x9f8   :  { %v1639_v23 = vadd.f32 1.0, %v3987_v22 }
 0x9f9   :  { %v3989_v24 = vpop.eup %3988 }
 0x9fa   :  { %v1640_v27 = vadd.f32 1.0, %v3989_v24  ;;  %v1641_v28 = vmul.f32 %v1639_v23, %v1625_v25 }
 0x9fc   :  { %v1642_v29 = vmul.f32 %v1640_v27, %v1626_v26  ;;  %v3316_v27 = vld [vmem:[%s4692_s1 + $0x90] ss:$0 sm:$0xff] }
 0x9fe   :  { %v1643_v30 = vpack.c.bf16 %v1642_v29, %v1641_v28 }
 0xa00   :  { %3615 = vmatmul.mubr.msk.bf16.vlgmr.msra.gmra.mrb[48].mxu0 %vm1681_vm2, %v1643_v30 }
 0xa01   :  { %3638 = vmatprep.mubr.msk.bf16.mxu0 %vm4064_vm13, %v4063_v4  ;;  %3635 = vmatpush3.bf16.msra.mxu0 %v3933_v51 }
 0xa02   :  { %3636 = vmatprep.subr.bf16.mxu0 %v4063_v4 }
 0xa05   :  { %3637 = vmatpush3.bf16.msra.mxu0 %v3935_v53 }
 0xa06   :  { %3648 = vmatprep.subr.bf16.mxu0 %v4063_v4 }
 0xad3   :  { %v1719_v32 = vpop.f32.mrb[48].mxu0 }
 0xad4   :  { %v1720_v33 = vadd.f32 %v3304_v31, %v1719_v32  ;;  %v3616_v34 = vpop.f32.mrb[49].mxu0 }
 0xad5   :  { %v1722_v35 = vpop.f32.mrb[50].mxu0 }
 0xad6   :  { %v1723_v36 = vadd.f32 %v3304_v31, %v1722_v35  ;;  %v3617_v37 = vpop.f32.mrb[51].mxu0  ;;  %v1726_v38 = vadd.f32 %v1720_v33, %v1557_v58 }
 0xad8   :  { %v1730_v39 = vsel %vm263_vm12, %v1726_v38, 0.0  ;;  %v1727_v40 = vadd.f32 %v1723_v36, %v1558_v59 }
 0xad9   :  { %1731 = vadd.xlane.f32.xlu1 %v1730_v39 }
 0xada   :  { %v1733_v41 = vsel %vm263_vm12, %v1727_v40, 0.0 }
 0xadb   :  { %1734 = vadd.xlane.f32.xlu0 %v1733_v41 }
 0xb66   :  { %v1732_v42 = vpop.xlane.xlu1 %1731 }
 0xb67   :  { %v1736_v43 = vmul.f32 0.03125, %v1732_v42 }
 0xb68   :  { %v1735_v60 = vpop.xlane.xlu0 %1734 }
 0xb69   :  { %v1738_v61 = vsub.f32 %v1726_v38, %v1736_v43  ;;  %v1737_v44 = vmul.f32 0.03125, %v1735_v60 }
 0xb6b   :  { %v1739_v45 = vsub.f32 %v1727_v40, %v1737_v44  ;;  %v1740_v46 = vmul.f32 %v1738_v61, %v1738_v61 }
 0xb6d   :  { %v1742_v47 = vsel %vm263_vm12, %v1740_v46, 0.0  ;;  %v1741_v48 = vmul.f32 %v1739_v45, %v1739_v45 }
 0xb6e   :  { %1743 = vadd.xlane.f32.xlu1 %v1742_v47 }
 0xb6f   :  { %v1745_v49 = vsel %vm263_vm12, %v1741_v48, 0.0 }
 0xb70   :  { %1746 = vadd.xlane.f32.xlu0 %v1745_v49 }
 0xbfb   :  { %v1744_v18 = vpop.xlane.xlu1 %1743 }
 0xbfc   :  { %v1748_v54 = vmul.f32 0.03125, %v1744_v18 }
 0xbfd   :  { %v1747_v55 = vpop.xlane.xlu0 %1746 }
 0xbfe   :  { %v1750_v56 = vadd.f32 1e-12, %v1748_v54  ;;  %v1749_v57 = vmul.f32 0.03125, %v1747_v55 }
 0xc00   :  { %3990 = vrsqrt.f32 %v1750_v56  ;;  %v1751_v58 = vadd.f32 1e-12, %v1749_v57 }
 0xc02   :  { %3992 = vrsqrt.f32 %v1751_v58 }
 0xc0a   :  { %v3991_v59 = vpop.eup %3990 }
 0xc0b   :  { %v1754_v63 = vmul.f32 %v3991_v59, %v1738_v61 }
 0xc0c   :  { %v3993_v0 = vpop.eup %3992 }
 0xc0d   :  { %v1760_v1 = vmul.f32 %v3310_v62, %v1754_v63  ;;  %v1755_v2 = vmul.f32 %v3993_v0, %v1739_v45 }
 0xc0f   :  { %v1761_v5 = vmul.f32 %v3310_v62, %v1755_v2  ;;  %v4428_v6 = vadd.f32 %v3311_v3, %v1760_v1 }
 0xc11   :  { %v4430_v7 = vadd.f32 %v3311_v3, %v1761_v5 }
 0xc13   :  { %v1768_v9 = vpack.c.bf16 %v4430_v7, %v4428_v6 }
 0xc15   :  { %3623 = vmatmul.mubr.msk.bf16.vlgmr.msra.gmra.mrb[40].mxu1 %vm263_vm12, %v1768_v9  ;;  %3639 = vmatmul.mubr.msk.bf16.vlgmr.msra.gmra.mrb[52].mxu0 %vm263_vm12, %v1768_v9 }
 0xc16   :  { %3627 = vmatpush3.bf16.msra.mxu1 %v3936_v8  ;;  %3630 = vmatprep.mubr.msk.bf16.mxu1 %vm4064_vm13, %v4063_v4 }
 0xc17   :  { %3628 = vmatprep.subr.bf16.mxu1 %v4063_v4  ;;  %3650 = vmatprep.mubr.msk.bf16.mxu0 %vm4064_vm13, %v4063_v4 }
 0xc1a   :  { %3629 = vmatpush3.bf16.msra.mxu1 %v3937_v10 }
 0xc1b   :  { %3642 = vmatprep.subr.bf16.mxu1 %v4063_v4 }
 0xc1d   :  { %3631 = vmatmul.mubr.msk.bf16.vlgmr.msra.gmra.mrb[44].mxu1 %vm263_vm12, %v1768_v9 }
 0xc1e   :  { %3644 = vmatprep.mubr.msk.bf16.mxu1 %vm4064_vm13, %v4063_v4 }
 0xce8   :  { %v1827_v13 = vpop.f32.mrb[40].mxu1  ;;  %v1951_v14 = vpop.f32.mrb[52].mxu0 }
 0xce9   :  { %v3624_v16 = vpop.f32.mrb[41].mxu1  ;;  %v3640_v17 = vpop.f32.mrb[53].mxu0  ;;  %v1828_v20 = vadd.f32 %v3312_v11, %v1827_v13  ;;  %v4459_v25 = vadd.f32 %v3320_v15, %v1951_v14 }
 0xcea   :  { %v1830_v19 = vpop.f32.mrb[42].mxu1  ;;  %v1954_v12 = vpop.f32.mrb[54].mxu0 }
 0xceb   :  { %v1831_v21 = vadd.f32 %v3312_v11, %v1830_v19  ;;  %v4457_v22 = vadd.f32 %v3320_v15, %v1954_v12  ;;  %v3625_v23 = vpop.f32.mrb[43].mxu1  ;;  %v3641_v24 = vpop.f32.mrb[55].mxu0  ;;  %v1978_v40 = vpack.c.bf16 %v1828_v20, %v1828_v20  ;;  %v2034_v15 = vpack.c.bf16 %v4459_v25, %v4459_v25 }
 0xced   :  { %v3863_v26 = vpack.i.bf16 %v1831_v21, %v1828_v20  ;;  %v4466_v28 = vpack.i.bf16 %v4457_v22, %v4459_v25  ;;  %v1979_v41 = vpack.c.bf16 %v1831_v21, %v1831_v21  ;;  %v2035_v16 = vpack.c.bf16 %v4457_v22, %v4457_v22 }
 0xcee   :  { %v2518_v12 = vsel %vm1053_vm15, %v2034_v15, 0 }
 0xcef   :  { %3864 = vrot.lane.b32.xlu0 %v3863_v26, %s4065_s19  ;;  %v2564_v20 = vsel %vm1053_vm15, %v2035_v16, 0 }
 0xcf0   :  { %v1889_v29 = vpop.f32.mrb[44].mxu1 }
 0xcf1   :  { %v1890_v30 = vadd.f32 %v3316_v27, %v1889_v29  ;;  %v3632_v31 = vpop.f32.mrb[45].mxu1 }
 0xcf2   :  { %v1892_v32 = vpop.f32.mrb[46].mxu1 }
 0xcf3   :  { %v1893_v33 = vadd.f32 %v3316_v27, %v1892_v32  ;;  %v3633_v34 = vpop.f32.mrb[47].mxu1  ;;  %v2006_v35 = vpack.c.bf16 %v1890_v30, %v1890_v30 }
 0xcf5   :  { %v2046_v36 = vsel %vm577_vm14, %v2006_v35, 0  ;;  %v3878_v37 = vpack.i.bf16 %v1893_v33, %v1890_v30  ;;  %v2007_v38 = vpack.c.bf16 %v1893_v33, %v1893_v33 }
 0xcf6   :  { %3643 = vmatpush3.bf16.xpose.msra.mxu1 %v2046_v36 }
 0xcf7   :  { %3879 = vrot.lane.b32.xlu0 %v3878_v37, %s4066_s20  ;;  %3859 = vrot.lane.b32.xlu1 %v3878_v37, %s4065_s19  ;;  %v2092_v39 = vsel %vm577_vm14, %v2007_v38, 0 }
 0xcf8   :  { %3649 = vmatpush3.bf16.xpose.msra.mxu0 %v2092_v39  ;;  %3654 = vmatprep.subr.bf16.mxu1 %v4063_v4 }
 0xcf9   :  { %3660 = vmatprep.subr.bf16.mxu0 %v4063_v4 }
 0xcfb   :  { %3869 = vrot.lane.b32.xlu1 %v3878_v37, %s4067_s21 }
 0xcfd   :  { %3645 = vmatmul.mubr.msk.bf16.vlgmr.msra.gmra.mrb[48].mxu1 %vm577_vm14, %v1978_v40 }
 0xcfe   :  { %3656 = vmatprep.mubr.msk.bf16.mxu1 %vm4064_vm13, %v4063_v4 }
 0xcff   :  { %3874 = vrot.lane.b32.xlu1 %v3863_v26, %s4067_s21  ;;  %3651 = vmatmul.mubr.msk.bf16.vlgmr.msra.gmra.mrb[56].mxu0 %vm577_vm14, %v1979_v41 }
 0xd00   :  { %3662 = vmatprep.mubr.msk.bf16.mxu0 %vm4064_vm13, %v4063_v4 }
 0xd03   :  { %3884 = vrot.lane.b32.xlu1 %v3863_v26, %s4066_s20 }
 0xd61   :  { %v3865_v45 = vpop.permute.xlu0 %3864 }
 0xd62   :  { %v3867_v51 = vunpack.i.h.bf16 %v3865_v45  ;;  %v3866_v52 = vunpack.i.l.bf16 %v3865_v45 }
 0xd64   :  { %v1981_v55 = vpack.c.bf16 %v3867_v51, %v3867_v51  ;;  %v1980_v56 = vpack.c.bf16 %v3866_v52, %v3866_v52 }
 0xd69   :  { %v3860_v42 = vpop.permute.xlu1 %3859  ;;  %v3880_v54 = vpop.permute.xlu0 %3879 }
 0xd6a   :  { %v3862_v43 = vunpack.i.h.bf16 %v3860_v42  ;;  %v3861_v60 = vunpack.i.l.bf16 %v3860_v42  ;;  %v3882_v58 = vunpack.i.h.bf16 %v3880_v54  ;;  %v3881_v59 = vunpack.i.l.bf16 %v3880_v54 }
 0xd6c   :  { %v2009_v61 = vpack.c.bf16 %v3862_v43, %v3862_v43  ;;  %v2008_v44 = vpack.c.bf16 %v3861_v60, %v3861_v60  ;;  %v2013_v2 = vpack.c.bf16 %v3882_v58, %v3882_v58  ;;  %v2012_v3 = vpack.c.bf16 %v3881_v59, %v3881_v59 }
 0xd6d   :  { %v3870_v46 = vpop.permute.xlu1 %3869 }
 0xd6e   :  { %v3872_v47 = vunpack.i.h.bf16 %v3870_v46  ;;  %v3871_v48 = vunpack.i.l.bf16 %v3870_v46  ;;  %v2138_v49 = vsel %vm577_vm14, %v2008_v44, 0  ;;  %v2184_v50 = vsel %vm577_vm14, %v2009_v61, 0 }
 0xd6f   :  { %3655 = vmatpush3.bf16.xpose.msra.mxu1 %v2138_v49  ;;  %3661 = vmatpush3.bf16.xpose.msra.mxu0 %v2184_v50  ;;  %v2322_v10 = vsel %vm577_vm14, %v2012_v3, 0  ;;  %v2368_v11 = vsel %vm577_vm14, %v2013_v2, 0 }
 0xd70   :  { %3666 = vmatprep.subr.bf16.mxu1 %v4063_v4  ;;  %3672 = vmatprep.subr.bf16.mxu0 %v4063_v4  ;;  %v2011_v53 = vpack.c.bf16 %v3872_v47, %v3872_v47  ;;  %v2010_v18 = vpack.c.bf16 %v3871_v48, %v3871_v48 }
 0xd71   :  { %v3875_v57 = vpop.permute.xlu1 %3874 }
 0xd72   :  { %v2230_v62 = vsel %vm577_vm14, %v2010_v18, 0  ;;  %v2276_v63 = vsel %vm577_vm14, %v2011_v53, 0  ;;  %v3877_v0 = vunpack.i.h.bf16 %v3875_v57  ;;  %v3876_v1 = vunpack.i.l.bf16 %v3875_v57 }
 0xd74   :  { %v1983_v5 = vpack.c.bf16 %v3877_v0, %v3877_v0  ;;  %v1982_v8 = vpack.c.bf16 %v3876_v1, %v3876_v1 }
 0xd75   :  { %v3885_v9 = vpop.permute.xlu1 %3884 }
 0xd76   :  { %3657 = vmatmul.mubr.msk.bf16.vlgmr.msra.gmra.mrb[52].mxu1 %vm577_vm14, %v1980_v56  ;;  %3663 = vmatmul.mubr.msk.bf16.vlgmr.msra.gmra.mrb[60].mxu0 %vm577_vm14, %v1981_v55  ;;  %v3887_v13 = vunpack.i.h.bf16 %v3885_v9  ;;  %v3886_v14 = vunpack.i.l.bf16 %v3885_v9 }
 0xd77   :  { %3667 = vmatpush3.bf16.xpose.msra.mxu1 %v2230_v62  ;;  %3673 = vmatpush3.bf16.xpose.msra.mxu0 %v2276_v63 }
 0xd78   :  { %3668 = vmatprep.mubr.msk.bf16.mxu1 %vm4064_vm13, %v4063_v4  ;;  %3674 = vmatprep.mubr.msk.bf16.mxu0 %vm4064_vm13, %v4063_v4  ;;  %v1985_v17 = vpack.c.bf16 %v3887_v13, %v3887_v13  ;;  %v1984_v19 = vpack.c.bf16 %v3886_v14, %v3886_v14 }
 0xd79   :  { %3678 = vmatprep.subr.bf16.mxu1 %v4063_v4  ;;  %3684 = vmatprep.subr.bf16.mxu0 %v4063_v4 }
 0xd7e   :  { %3669 = vmatmul.mubr.msk.bf16.vlgmr.msra.gmra.mrb[56].mxu1 %vm577_vm14, %v1982_v8  ;;  %3675 = vmatmul.mubr.msk.bf16.vlgmr.msra.gmra.mrb[64].mxu0 %vm577_vm14, %v1983_v5 }
 0xd7f   :  { %3679 = vmatpush3.bf16.xpose.msra.mxu1 %v2322_v10  ;;  %3685 = vmatpush3.bf16.xpose.msra.mxu0 %v2368_v11 }
 0xd80   :  { %3680 = vmatprep.mubr.msk.bf16.mxu1 %vm4064_vm13, %v4063_v4  ;;  %3686 = vmatprep.mubr.msk.bf16.mxu0 %vm4064_vm13, %v4063_v4 }
 0xd81   :  { %3690 = vmatprep.subr.bf16.mxu1 %v4063_v4  ;;  %3696 = vmatprep.subr.bf16.mxu0 %v4063_v4 }
 0xd86   :  { %3681 = vmatmul.mubr.msk.bf16.vlgmr.msra.gmra.mrb[60].mxu1 %vm577_vm14, %v1984_v19  ;;  %3687 = vmatmul.mubr.msk.bf16.vlgmr.msra.gmra.mrb[68].mxu0 %vm577_vm14, %v1985_v17 }
 0xd87   :  { %3691 = vmatpush3.bf16.msra.mxu1 %v2518_v12  ;;  %3697 = vmatpush3.bf16.msra.mxu0 %v2564_v20 }
 0xd88   :  { %3698 = vmatprep.mubr.msk.bf16.mxu0 %vm4064_vm13, %v4063_v4  ;;  %3708 = vmatprep.subr.bf16.mxu0 %v4063_v4 }
 0xd89   :  { %3692 = vmatprep.mubr.msk.bf16.mxu1 %vm4064_vm13, %v4063_v4  ;;  %3702 = vmatprep.subr.bf16.mxu1 %v4063_v4 }
 0xdd0   :  { %v2082_v21 = vpop.f32.mrb[48].mxu1 }
 0xdd1   :  { %v4522_v22 = vmul.f32 0.35355338, %v2082_v21  ;;  %v3646_v23 = vpop.f32.mrb[49].mxu1 }
 0xdd2   :  { %v2085_v24 = vpop.f32.mrb[50].mxu1  ;;  %v2128_v25 = vpop.f32.mrb[56].mxu0 }
 0xdd3   :  { %v2411_v26 = vmul.f32 0.35355338, %v2128_v25  ;;  %v3647_v27 = vpop.f32.mrb[51].mxu1  ;;  %v3652_v29 = vpop.f32.mrb[57].mxu0  ;;  %v2418_v30 = vsel %vm577_vm14, %v4522_v22, -inf }
 0xdd4   :  { %2419 = vmax.xlane.f32.xlu0 %v2418_v30  ;;  %v2131_v31 = vpop.f32.mrb[58].mxu0 }
 0xdd5   :  { %v3653_v32 = vpop.f32.mrb[59].mxu0  ;;  %v2421_v33 = vsel %vm577_vm14, %v2411_v26, -inf }
 0xdd6   :  { %2422 = vmax.xlane.f32.xlu1 %v2421_v33 }
 0xe49   :  { %v2174_v34 = vpop.f32.mrb[52].mxu1  ;;  %v2220_v35 = vpop.f32.mrb[60].mxu0 }
 0xe4a   :  { %v2412_v36 = vmul.f32 0.35355338, %v2174_v34  ;;  %v3658_v37 = vpop.f32.mrb[53].mxu1  ;;  %v3664_v38 = vpop.f32.mrb[61].mxu0  ;;  %v2413_v41 = vmul.f32 0.35355338, %v2220_v35 }
 0xe4b   :  { %v2177_v39 = vpop.f32.mrb[54].mxu1  ;;  %v2223_v40 = vpop.f32.mrb[62].mxu0 }
 0xe4c   :  { %v3659_v42 = vpop.f32.mrb[55].mxu1  ;;  %v3665_v43 = vpop.f32.mrb[63].mxu0  ;;  %v2424_v60 = vsel %vm577_vm14, %v2412_v36, -inf  ;;  %v2427_v61 = vsel %vm577_vm14, %v2413_v41, -inf }
 0xe4d   :  { %2425 = vmax.xlane.f32.xlu0 %v2424_v60 }
 0xe51   :  { %v2266_v44 = vpop.f32.mrb[56].mxu1  ;;  %2428 = vmax.xlane.f32.xlu0 %v2427_v61  ;;  %v2312_v45 = vpop.f32.mrb[64].mxu0 }
 0xe52   :  { %v2414_v46 = vmul.f32 0.35355338, %v2266_v44  ;;  %v2415_v47 = vmul.f32 0.35355338, %v2312_v45  ;;  %v3670_v48 = vpop.f32.mrb[57].mxu1  ;;  %v3676_v49 = vpop.f32.mrb[65].mxu0 }
 0xe53   :  { %v2269_v50 = vpop.f32.mrb[58].mxu1  ;;  %v2315_v51 = vpop.f32.mrb[66].mxu0 }
 0xe54   :  { %v3671_v52 = vpop.f32.mrb[59].mxu1  ;;  %v3677_v53 = vpop.f32.mrb[67].mxu0  ;;  %v2430_v18 = vsel %vm577_vm14, %v2414_v46, -inf  ;;  %v2433_v54 = vsel %vm577_vm14, %v2415_v47, -inf }
 0xe55   :  { %2431 = vmax.xlane.f32.xlu1 %v2430_v18  ;;  %2434 = vmax.xlane.f32.xlu0 %v2433_v54 }
 0xe59   :  { %v2358_v55 = vpop.f32.mrb[60].mxu1  ;;  %v2404_v56 = vpop.f32.mrb[68].mxu0 }
 0xe5a   :  { %v2416_v57 = vmul.f32 0.35355338, %v2358_v55  ;;  %v2417_v58 = vmul.f32 0.35355338, %v2404_v56  ;;  %v3682_v59 = vpop.f32.mrb[61].mxu1  ;;  %v3688_v62 = vpop.f32.mrb[69].mxu0 }
 0xe5b   :  { %v2361_v63 = vpop.f32.mrb[62].mxu1  ;;  %v2407_v0 = vpop.f32.mrb[70].mxu0 }
 0xe5c   :  { %v3683_v1 = vpop.f32.mrb[63].mxu1  ;;  %v3689_v2 = vpop.f32.mrb[71].mxu0  ;;  %v2436_v3 = vsel %vm577_vm14, %v2416_v57, -inf  ;;  %v2439_v5 = vsel %vm577_vm14, %v2417_v58, -inf }
 0xe5d   :  { %2437 = vmax.xlane.f32.xlu1 %v2436_v3  ;;  %2440 = vmax.xlane.f32.xlu0 %v2439_v5 }
 0xe61   :  { %v2420_v14 = vpop.xlane.xlu0 %2419 }
 0xe62   :  { %v2442_v15 = vsub.f32 %v4522_v22, %v2420_v14 }
 0xe63   :  { %v2423_v8 = vpop.xlane.xlu1 %2422 }
 0xe64   :  { %v2443_v9 = vsub.f32 %v2411_v26, %v2423_v8  ;;  %v2450_v16 = vmul.f32 1.442695, %v2442_v15 }
 0xe66   :  { %v2452_v10 = vmul.f32 1.442695, %v2443_v9 }
 0xe68   :  { %3994 = vpow2.f32 %v2452_v10 }
 0xe69   :  { %3996 = vpow2.f32 %v2450_v16 }
 0xe6e   :  { %3889 = vrot.lane.b32.xlu1 %v4466_v28, %s4065_s19 }
 0xe72   :  { %v3995_v11 = vpop.eup %3994 }
 0xe73   :  { %v2469_v13 = vsel %vm577_vm14, %v3995_v11, 0.0  ;;  %v4537_v17 = vpop.eup %3996 }
 0xe74   :  { %2470 = vadd.xlane.f32.xlu0 %v2469_v13  ;;  %v2466_v19 = vsel %vm577_vm14, %v4537_v17, 0.0 }
 0xe92   :  { %2467 = vadd.xlane.f32.xlu1 %v2466_v19 }
 0xeda   :  { %v2426_v12 = vpop.xlane.xlu0 %2425 }
 0xedb   :  { %v2444_v20 = vsub.f32 %v2412_v36, %v2426_v12 }
 0xedd   :  { %v2454_v21 = vmul.f32 1.442695, %v2444_v20 }
 0xede   :  { %v2429_v23 = vpop.xlane.xlu0 %2428 }
 0xedf   :  { %3998 = vpow2.f32 %v2454_v21  ;;  %v2445_v24 = vsub.f32 %v2413_v41, %v2429_v23 }
 0xee1   :  { %v2456_v25 = vmul.f32 1.442695, %v2445_v24 }
 0xee2   :  { %v2432_v26 = vpop.xlane.xlu1 %2431  ;;  %v2435_v27 = vpop.xlane.xlu0 %2434 }
 0xee3   :  { %4000 = vpow2.f32 %v2456_v25  ;;  %v2446_v29 = vsub.f32 %v2414_v46, %v2432_v26  ;;  %v2447_v22 = vsub.f32 %v2415_v47, %v2435_v27 }
 0xee5   :  { %v2458_v30 = vmul.f32 1.442695, %v2446_v29  ;;  %v2460_v31 = vmul.f32 1.442695, %v2447_v22 }
 0xee7   :  { %4002 = vpow2.f32 %v2458_v30 }
 0xee8   :  { %4004 = vpow2.f32 %v2460_v31 }
 0xee9   :  { %v3999_v32 = vpop.eup %3998 }
 0xeea   :  { %v2438_v33 = vpop.xlane.xlu1 %2437  ;;  %v2441_v34 = vpop.xlane.xlu0 %2440  ;;  %v2472_v35 = vsel %vm577_vm14, %v3999_v32, 0.0 }
 0xeeb   :  { %v2448_v36 = vsub.f32 %v2416_v57, %v2438_v33  ;;  %v2449_v37 = vsub.f32 %v2417_v58, %v2441_v34  ;;  %2473 = vadd.xlane.f32.xlu1 %v2472_v35 }
 0xeed   :  { %v4001_v38 = vpop.eup %4000  ;;  %v2462_v39 = vmul.f32 1.442695, %v2448_v36  ;;  %v2464_v40 = vmul.f32 1.442695, %v2449_v37 }
 0xeee   :  { %v2475_v41 = vsel %vm577_vm14, %v4001_v38, 0.0  ;;  %v3890_v49 = vpop.permute.xlu1 %3889 }
 0xeef   :  { %4006 = vpow2.f32 %v2462_v39  ;;  %2476 = vadd.xlane.f32.xlu0 %v2475_v41  ;;  %v3892_v50 = vunpack.i.h.bf16 %v3890_v49  ;;  %v3891_v56 = vunpack.i.l.bf16 %v3890_v49 }
 0xef0   :  { %4008 = vpow2.f32 %v2464_v40 }
 0xef1   :  { %v4543_v42 = vpop.eup %4002  ;;  %v2037_v52 = vpack.c.bf16 %v3892_v50, %v3892_v50  ;;  %v2036_v58 = vpack.c.bf16 %v3891_v56, %v3891_v56 }
 0xef2   :  { %v4545_v43 = vpop.eup %4004  ;;  %v2478_v60 = vsel %vm577_vm14, %v4543_v42, 0.0 }
 0xef3   :  { %2479 = vadd.xlane.f32.xlu1 %v2478_v60  ;;  %v2481_v61 = vsel %vm577_vm14, %v4545_v43, 0.0  ;;  %v2656_v54 = vsel %vm1053_vm15, %v2037_v52, 0  ;;  %v2610_v63 = vsel %vm1053_vm15, %v2036_v58, 0 }
 0xef4   :  { %2482 = vadd.xlane.f32.xlu0 %v2481_v61 }
 0xef9   :  { %v4551_v44 = vpop.eup %4006 }
 0xefa   :  { %v4553_v45 = vpop.eup %4008  ;;  %v2484_v46 = vsel %vm577_vm14, %v4551_v44, 0.0 }
 0xefb   :  { %2485 = vadd.xlane.f32.xlu1 %v2484_v46  ;;  %v2487_v47 = vsel %vm577_vm14, %v4553_v45, 0.0 }
 0xefc   :  { %2488 = vadd.xlane.f32.xlu0 %v2487_v47 }
 0xf01   :  { %v2471_v48 = vpop.xlane.xlu0 %2470 }
 0xf02   :  { %4010 = vrcp.f32 %v2471_v48 }
 0xf0c   :  { %v4011_v51 = vpop.eup %4010  ;;  %3899 = vrot.lane.b32.xlu1 %v4466_v28, %s4066_s20  ;;  %s4071_s20 = smov [#allocation2]  }
 0xf0d   :  { %v2499_v53 = vmul.f32 %v4011_v51, %v3995_v11 }
 0xf0f   :  { %v2507_v18 = vpack.c.bf16 %v2499_v53, %v2499_v53 }
 0xf11   :  { %3699 = vmatmul.mubr.msk.bf16.vlgmr.msra.gmra.mrb[72].mxu0 %vm577_vm14, %v2507_v18 }
 0xf12   :  { %3894 = vrot.lane.b32.xlu0 %v4466_v28, %s4067_s21  ;;  %3709 = vmatpush3.bf16.msra.mxu0 %v2656_v54  ;;  %s3242_s21 = sshll.u32 %s4071_s20, 4  ;;  %s3243_s21 = int_to_ptr.vmem [resolvable:$true] %s3242_s21 }
 0xf13   :  { %3710 = vmatprep.mubr.msk.bf16.mxu0 %vm4064_vm13, %v4063_v4  ;;  %3720 = vmatprep.subr.bf16.mxu0 %v4063_v4  ;;  %s4038_s29 = scalar_lea.vmem %s3243_s21, 32  ;;  %p4043_p1 = scmp.lt.s32.totalorder %s3243_s21, %s3243_s21 }
 0xf14   :  { %p4039_p0 = scmp.ne.s32.totalorder %s3243_s21, %s4038_s29  ;;  %p4044_p2 = scmp.lt.s32.totalorder %s4038_s29, %s4038_s29 }
 0xf16   :  { %p4045_p3 = por %p4044_p2, %p4043_p1 }
 0xf18   :  { %p4046_p4 = pnand %p4045_p3, %p4039_p0 }
 0xf1f   :  { %v2468_v55 = vpop.xlane.xlu1 %2467 }
 0xf20   :  { %4012 = vrcp.f32 %v2468_v55  ;;  %v3938_v55 = vld [vmem:[%s4693_s2 + $0xa0] sm:$0xff]  }
 0xf2a   :  { %v4013_v57 = vpop.eup %4012 }
 0xf2b   :  { %v2498_v59 = vmul.f32 %v4013_v57, %v4537_v17  ;;  %v3939_v57 = vld [vmem:[%s4693_s2 + $0xa8] sm:$0xff]  }
 0xf2d   :  { %v2506_v62 = vpack.c.bf16 %v2498_v59, %v2498_v59 }
 0xf2f   :  { %3693 = vmatmul.mubr.msk.bf16.vlgmr.msra.gmra.mrb[64].mxu1 %vm577_vm14, %v2506_v62 }
 0xf30   :  { %3703 = vmatpush3.bf16.msra.mxu1 %v2610_v63  ;;  %3704 = vmatprep.mubr.msk.bf16.mxu1 %vm4064_vm13, %v4063_v4 }
 0xf31   :  { %3714 = vmatprep.subr.bf16.mxu1 %v4063_v4 }
 0xf78   :  { %v2474_v28 = vpop.xlane.xlu1 %2473 }
 0xf79   :  { %4014 = vrcp.f32 %v2474_v28 }
 0xf7c   :  { %v2477_v0 = vpop.xlane.xlu0 %2476 }
 0xf7d   :  { %4016 = vrcp.f32 %v2477_v0 }
 0xf80   :  { %v2480_v1 = vpop.xlane.xlu1 %2479 }
 0xf81   :  { %v2483_v2 = vpop.xlane.xlu0 %2482  ;;  %4018 = vrcp.f32 %v2480_v1 }
 0xf82   :  { %4020 = vrcp.f32 %v2483_v2 }
 0xf83   :  { %v4015_v3 = vpop.eup %4014 }
 0xf84   :  { %v2500_v5 = vmul.f32 %v4015_v3, %v3999_v32 }
 0xf86   :  { %v2508_v8 = vpack.c.bf16 %v2500_v5, %v2500_v5 }
 0xf87   :  { %v4017_v9 = vpop.eup %4016 }
 0xf88   :  { %v2501_v10 = vmul.f32 %v4017_v9, %v4001_v38  ;;  %v2486_v11 = vpop.xlane.xlu1 %2485  ;;  %3705 = vmatmul.mubr.msk.bf16.vlgmr.msra.gmra.mrb[68].mxu1 %vm577_vm14, %v2508_v8 }
 0xf89   :  { %v2489_v13 = vpop.xlane.xlu0 %2488  ;;  %3716 = vmatprep.mubr.msk.bf16.mxu1 %vm4064_vm13, %v4063_v4  ;;  %4022 = vrcp.f32 %v2486_v11 }
 0xf8a   :  { %v2509_v14 = vpack.c.bf16 %v2501_v10, %v2501_v10  ;;  %4024 = vrcp.f32 %v2489_v13 }
 0xf8b   :  { %v4019_v15 = vpop.eup %4018 }
 0xf8c   :  { %v3900_v16 = vpop.permute.xlu1 %3899  ;;  %3711 = vmatmul.mubr.msk.bf16.vlgmr.msra.gmra.mrb[76].mxu0 %vm577_vm14, %v2509_v14  ;;  %v4021_v17 = vpop.eup %4020  ;;  %v2502_v24 = vmul.f32 %v4019_v15, %v4543_v42 }
 0xf8d   :  { %v3895_v19 = vpop.permute.xlu0 %3894  ;;  %3722 = vmatprep.mubr.msk.bf16.mxu0 %vm4064_vm13, %v4063_v4  ;;  %v3902_v12 = vunpack.i.h.bf16 %v3900_v16  ;;  %v3901_v20 = vunpack.i.l.bf16 %v3900_v16  ;;  %v2503_v25 = vmul.f32 %v4021_v17, %v4545_v43 }
 0xf8e   :  { %v3897_v21 = vunpack.i.h.bf16 %v3895_v19  ;;  %v3896_v23 = vunpack.i.l.bf16 %v3895_v19  ;;  %v2510_v33 = vpack.c.bf16 %v2502_v24, %v2502_v24 }
 0xf8f   :  { %v2041_v29 = vpack.c.bf16 %v3902_v12, %v3902_v12  ;;  %v2040_v22 = vpack.c.bf16 %v3901_v20, %v3901_v20  ;;  %v2511_v34 = vpack.c.bf16 %v2503_v25, %v2503_v25 }
 0xf90   :  { %v2039_v26 = vpack.c.bf16 %v3897_v21, %v3897_v21  ;;  %v2038_v27 = vpack.c.bf16 %v3896_v23, %v3896_v23 }
 0xf91   :  { %v2794_v36 = vsel %vm1053_vm15, %v2040_v22, 0  ;;  %v2840_v37 = vsel %vm1053_vm15, %v2041_v29, 0 }
 0xf92   :  { %v2702_v30 = vsel %vm1053_vm15, %v2038_v27, 0  ;;  %v2748_v31 = vsel %vm1053_vm15, %v2039_v26, 0 }
 0xf93   :  { %3715 = vmatpush3.bf16.msra.mxu1 %v2702_v30  ;;  %3721 = vmatpush3.bf16.msra.mxu0 %v2748_v31  ;;  %v4023_v32 = vpop.eup %4022 }
 0xf94   :  { %3726 = vmatprep.subr.bf16.mxu1 %v4063_v4  ;;  %3732 = vmatprep.subr.bf16.mxu0 %v4063_v4  ;;  %v4025_v35 = vpop.eup %4024  ;;  %v2504_v38 = vmul.f32 %v4023_v32, %v4551_v44 }
 0xf95   :  { %v2505_v39 = vmul.f32 %v4025_v35, %v4553_v45 }
 0xf96   :  { %3717 = vmatmul.mubr.msk.bf16.vlgmr.msra.gmra.mrb[72].mxu1 %vm577_vm14, %v2510_v33  ;;  %3723 = vmatmul.mubr.msk.bf16.vlgmr.msra.gmra.mrb[80].mxu0 %vm577_vm14, %v2511_v34  ;;  %v2512_v40 = vpack.c.bf16 %v2504_v38, %v2504_v38  ;;  %v3340_v34 = vld [vmem:[%s4692_s1 + $0xa0] ss:$0 sm:$0xff] }
 0xf97   :  { %3727 = vmatpush3.bf16.msra.mxu1 %v2794_v36  ;;  %3733 = vmatpush3.bf16.msra.mxu0 %v2840_v37  ;;  %v2513_v41 = vpack.c.bf16 %v2505_v39, %v2505_v39 }
 0xf98   :  { %3728 = vmatprep.mubr.msk.bf16.mxu1 %vm4064_vm13, %v4063_v4  ;;  %3734 = vmatprep.mubr.msk.bf16.mxu0 %vm4064_vm13, %v4063_v4 }
 0xf99   :  { %3738 = vmatprep.subr.bf16.mxu1 %v4063_v4  ;;  %3746 = vmatprep.subr.bf16.mxu0 %v4063_v4 }
 0xf9e   :  { %3729 = vmatmul.mubr.msk.bf16.vlgmr.msra.gmra.mrb[76].mxu1 %vm577_vm14, %v2512_v40  ;;  %3735 = vmatmul.mubr.msk.bf16.vlgmr.msra.gmra.mrb[84].mxu0 %vm577_vm14, %v2513_v41 }
 0xf9f   :  { %3742 = vmatprep.mubr.msk.bf16.mxu1 %vm4064_vm13, %v4063_v4  ;;  %3750 = vmatprep.mubr.msk.bf16.mxu0 %vm4064_vm13, %v4063_v4 }
 0xfa0   :  { %3739 = vmatpush3.bf16.msra.mxu1 %v3938_v55 }
 0xfa1   :  { %3740 = vmatprep.subr.bf16.mxu1 %v4063_v4 }
 0xfa4   :  { %3741 = vmatpush3.bf16.msra.mxu1 %v3939_v57 }
 0xfa5   :  { %3754 = vmatprep.subr.bf16.mxu1 %v4063_v4 }
 0xfe4   :  { %v2600_v42 = vpop.f32.mrb[72].mxu0 }
 0xfe5   :  { %v3700_v43 = vpop.f32.mrb[73].mxu0 }
 0xfe6   :  { %v2603_v60 = vpop.f32.mrb[74].mxu0 }
 0xfe7   :  { %v3701_v61 = vpop.f32.mrb[75].mxu0 }
0x1002   :  { %v2554_v44 = vpop.f32.mrb[64].mxu1 }
0x1003   :  { %v3694_v45 = vpop.f32.mrb[65].mxu1 }
0x1004   :  { %v2557_v46 = vpop.f32.mrb[66].mxu1 }
0x1005   :  { %v3695_v47 = vpop.f32.mrb[67].mxu1 }
0x105b   :  { %v2646_v48 = vpop.f32.mrb[68].mxu1 }
0x105c   :  { %v3706_v49 = vpop.f32.mrb[69].mxu1 }
0x105d   :  { %v2649_v50 = vpop.f32.mrb[70].mxu1 }
0x105e   :  { %v3707_v51 = vpop.f32.mrb[71].mxu1 }
0x105f   :  { %v2692_v52 = vpop.f32.mrb[76].mxu0 }
0x1060   :  { %v3903_v53 = vpack.i.bf16 %v2692_v52, %v2646_v48  ;;  %v3712_v18 = vpop.f32.mrb[77].mxu0  ;;  %v3941_v52 = vld [vmem:[%s4693_s2 + $0xb8] sm:$0xff]  }
0x1061   :  { %v2695_v54 = vpop.f32.mrb[78].mxu0 }
0x1062   :  { %3904 = vrot.lane.b32.xlu1 %v3903_v53, %s4068_s24  ;;  %v3713_v56 = vpop.f32.mrb[79].mxu0 }
0x1069   :  { %v2738_v58 = vpop.f32.mrb[72].mxu1  ;;  %v2784_v59 = vpop.f32.mrb[80].mxu0 }
0x106a   :  { %v3908_v62 = vpack.i.bf16 %v2784_v59, %v2738_v58  ;;  %v3718_v63 = vpop.f32.mrb[73].mxu1  ;;  %v3724_v28 = vpop.f32.mrb[81].mxu0 }
0x106b   :  { %v2741_v0 = vpop.f32.mrb[74].mxu1  ;;  %v2787_v1 = vpop.f32.mrb[82].mxu0 }
0x106c   :  { %v3719_v2 = vpop.f32.mrb[75].mxu1  ;;  %3909 = vrot.lane.b32.xlu0 %v3908_v62, %s4069_s27  ;;  %v3725_v3 = vpop.f32.mrb[83].mxu0  ;;  %v3344_v62 = vld [vmem:[%s4692_s1 + $0xa8] ss:$0 sm:$0xff]  ;;  %v3345_v1 = vld [vmem:[%s4692_s1 + $0xb0] ss:$0 sm:$0xff] }
0x1071   :  { %v2830_v5 = vpop.f32.mrb[76].mxu1  ;;  %v2876_v8 = vpop.f32.mrb[84].mxu0 }
0x1072   :  { %v3913_v9 = vpack.i.bf16 %v2876_v8, %v2830_v5  ;;  %v3730_v10 = vpop.f32.mrb[77].mxu1  ;;  %v3736_v11 = vpop.f32.mrb[85].mxu0 }
0x1073   :  { %v2833_v13 = vpop.f32.mrb[78].mxu1  ;;  %v2879_v14 = vpop.f32.mrb[86].mxu0  ;;  %v3943_v10 = vld [vmem:[%s4693_s2 + $0xc8] sm:$0xff]   ;;  %v3944_v11 = vld [vmem:[%s4693_s2 + $0xd0] sm:$0xff]  }
0x1074   :  { %v3731_v15 = vpop.f32.mrb[79].mxu1  ;;  %3914 = vrot.lane.b32.xlu1 %v3913_v9, %s4070_s28  ;;  %v3737_v16 = vpop.f32.mrb[87].mxu0  ;;  %v3942_v9 = vld [vmem:[%s4693_s2 + $0xc0] sm:$0xff]   ;;  %v3945_v13 = vld [vmem:[%s4693_s2 + $0xd8] sm:$0xff]  }
0x1075   :  { %v3346_v14 = vld [vmem:[%s4692_s1 + $0xb8] ss:$0 sm:$0xff] }
0x10d4   :  { %v3905_v17 = vpop.permute.xlu1 %3904 }
0x10d5   :  { %v3907_v12 = vunpack.i.h.bf16 %v3905_v17  ;;  %v3906_v20 = vunpack.i.l.bf16 %v3905_v17 }
0x10d7   :  { %v2907_v25 = vsel %vm577_vm14, %v2600_v42, %v3907_v12  ;;  %v2906_v26 = vsel %vm577_vm14, %v2554_v44, %v3906_v20 }
0x10de   :  { %v3910_v19 = vpop.permute.xlu0 %3909 }
0x10df   :  { %v3912_v21 = vunpack.i.h.bf16 %v3910_v19  ;;  %v3911_v23 = vunpack.i.l.bf16 %v3910_v19 }
0x10e1   :  { %v2909_v22 = vsel %vm1445_vm0, %v2907_v25, %v3912_v21  ;;  %v2908_v30 = vsel %vm1445_vm0, %v2906_v26, %v3911_v23 }
0x10e6   :  { %v3915_v24 = vpop.permute.xlu1 %3914 }
0x10e7   :  { %v3917_v27 = vunpack.i.h.bf16 %v3915_v24  ;;  %v3916_v29 = vunpack.i.l.bf16 %v3915_v24 }
0x10e9   :  { %v2911_v31 = vsel %vm1448_vm1, %v2909_v22, %v3917_v27  ;;  %v2910_v32 = vsel %vm1448_vm1, %v2908_v30, %v3916_v29 }
0x10ea   :  { %v2912_v33 = vpack.c.bf16 %v2911_v31, %v2910_v32 }
0x10ec   :  { %3743 = vmatmul.mubr.msk.bf16.vlgmr.msra.gmra.mrb[80].mxu1 %vm263_vm12, %v2912_v33 }
0x10ed   :  { %3762 = vmatprep.mubr.msk.bf16.mxu1 %vm4064_vm13, %v4063_v4  ;;  %3755 = vmatpush3.bf16.msra.mxu1 %v3942_v9  ;;  %v3357_v9 = vld [vmem:[%s4692_s1 + $0xd0] ss:$0 sm:$0xff] }
0x10ee   :  { %3756 = vmatprep.subr.bf16.mxu1 %v4063_v4 }
0x10f1   :  { %3757 = vmatpush3.bf16.msra.mxu1 %v3943_v10 }
0x10f2   :  { %3758 = vmatprep.subr.bf16.mxu1 %v4063_v4 }
0x10f5   :  { %3759 = vmatpush3.bf16.msra.mxu1 %v3944_v11 }
0x10f6   :  { %3760 = vmatprep.subr.bf16.mxu1 %v4063_v4 }
0x10f9   :  { %3761 = vmatpush3.bf16.msra.mxu1 %v3945_v13 }
0x11bf   :  { %v2971_v35 = vpop.f32.mrb[80].mxu1 }
0x11c0   :  { %v2972_v36 = vadd.f32 %v3340_v34, %v2971_v35  ;;  %v3744_v37 = vpop.f32.mrb[81].mxu1 }
0x11c1   :  { %v2974_v38 = vpop.f32.mrb[82].mxu1 }
0x11c2   :  { %v2975_v39 = vadd.f32 %v3340_v34, %v2974_v38  ;;  %v3745_v40 = vpop.f32.mrb[83].mxu1  ;;  %v2978_v41 = vadd.f32 %v2972_v36, %v4428_v6 }
0x11c3   :  { %v3350_v40 = vld [vmem:[%s4692_s1 + $0xc0] ss:$0 sm:$0xff] }
0x11c4   :  { %v2982_v42 = vsel %vm263_vm12, %v2978_v41, 0.0  ;;  %v2979_v43 = vadd.f32 %v2975_v39, %v4430_v7  ;;  %v3940_v7 = vld [vmem:[%s4693_s2 + $0xb0] sm:$0xff]  }
0x11c5   :  { %2983 = vadd.xlane.f32.xlu0 %v2982_v42  ;;  %3747 = vmatpush3.bf16.msra.mxu0 %v3940_v7 }
0x11c6   :  { %v2985_v60 = vsel %vm263_vm12, %v2979_v43, 0.0  ;;  %3748 = vmatprep.subr.bf16.mxu0 %v4063_v4 }
0x11c7   :  { %2986 = vadd.xlane.f32.xlu1 %v2985_v60 }
0x11c9   :  { %3749 = vmatpush3.bf16.msra.mxu0 %v3941_v52 }
0x1252   :  { %v2984_v61 = vpop.xlane.xlu0 %2983 }
0x1253   :  { %v2988_v44 = vmul.f32 0.03125, %v2984_v61 }
0x1254   :  { %v2987_v45 = vpop.xlane.xlu1 %2986 }
0x1255   :  { %v2990_v46 = vsub.f32 %v2978_v41, %v2988_v44  ;;  %v2989_v47 = vmul.f32 0.03125, %v2987_v45 }
0x1257   :  { %v2991_v48 = vsub.f32 %v2979_v43, %v2989_v47  ;;  %v2992_v49 = vmul.f32 %v2990_v46, %v2990_v46 }
0x1259   :  { %v2994_v50 = vsel %vm263_vm12, %v2992_v49, 0.0  ;;  %v2993_v51 = vmul.f32 %v2991_v48, %v2991_v48 }
0x125a   :  { %2995 = vadd.xlane.f32.xlu0 %v2994_v50 }
0x125b   :  { %v2997_v6 = vsel %vm263_vm12, %v2993_v51, 0.0 }
0x125e   :  { %2998 = vadd.xlane.f32.xlu0 %v2997_v6 }
0x12e7   :  { %v2996_v53 = vpop.xlane.xlu0 %2995 }
0x12e8   :  { %v3000_v18 = vmul.f32 0.03125, %v2996_v53 }
0x12ea   :  { %v3002_v54 = vadd.f32 1e-12, %v3000_v18 }
0x12eb   :  { %v2999_v55 = vpop.xlane.xlu0 %2998 }
0x12ec   :  { %4026 = vrsqrt.f32 %v3002_v54  ;;  %v3001_v56 = vmul.f32 0.03125, %v2999_v55 }
0x12ee   :  { %v3003_v57 = vadd.f32 1e-12, %v3001_v56 }
0x12f0   :  { %4028 = vrsqrt.f32 %v3003_v57 }
0x12f6   :  { %v4027_v58 = vpop.eup %4026 }
0x12f7   :  { %v3006_v59 = vmul.f32 %v4027_v58, %v2990_v46 }
0x12f9   :  { %v3012_v28 = vmul.f32 %v3344_v62, %v3006_v59 }
0x12fa   :  { %v4029_v63 = vpop.eup %4028 }
0x12fb   :  { %v3007_v0 = vmul.f32 %v4029_v63, %v2991_v48  ;;  %v3018_v3 = vadd.f32 %v3345_v1, %v3012_v28 }
0x12fd   :  { %v3013_v2 = vmul.f32 %v3344_v62, %v3007_v0 }
0x12ff   :  { %v3019_v5 = vadd.f32 %v3345_v1, %v3013_v2  ;;  %v3356_v2 = vld [vmem:[%s4692_s1 + $0xc8] ss:$0 sm:$0xff] }
0x1301   :  { %v3020_v8 = vpack.c.bf16 %v3019_v5, %v3018_v3 }
0x1303   :  { %3751 = vmatmul.mubr.msk.bf16.vlgmr.msra.gmra.mrb[88].mxu0 %vm263_vm12, %v3020_v8 }
0x13d6   :  { %v3079_v15 = vpop.f32.mrb[88].mxu0 }
0x13d7   :  { %v3080_v16 = vadd.f32 %v3346_v14, %v3079_v15  ;;  %v3752_v17 = vpop.f32.mrb[89].mxu0 }
0x13d8   :  { %v3082_v19 = vpop.f32.mrb[90].mxu0 }
0x13d9   :  { %v3088_v12 = vmul.f32 0.044715, %v3080_v16  ;;  %v3083_v20 = vadd.f32 %v3346_v14, %v3082_v19  ;;  %v3753_v21 = vpop.f32.mrb[91].mxu0  ;;  %v3086_v34 = vmul.f32 0.5, %v3080_v16 }
0x13db   :  { %v3090_v23 = vmul.f32 %v3088_v12, %v3080_v16  ;;  %v3089_v24 = vmul.f32 0.044715, %v3083_v20  ;;  %v3087_v35 = vmul.f32 0.5, %v3083_v20 }
0x13dd   :  { %v3092_v25 = vmul.f32 %v3090_v23, %v3080_v16  ;;  %v3091_v26 = vmul.f32 %v3089_v24, %v3083_v20 }
0x13df   :  { %v3094_v27 = vadd.f32 %v3092_v25, %v3080_v16  ;;  %v3093_v29 = vmul.f32 %v3091_v26, %v3083_v20 }
0x13e1   :  { %v3096_v22 = vmul.f32 0.7978846, %v3094_v27  ;;  %v3095_v4 = vadd.f32 %v3093_v29, %v3083_v20 }
0x13e3   :  { %4030 = vtanh.f32 %v3096_v22  ;;  %v3097_v30 = vmul.f32 0.7978846, %v3095_v4 }
0x13e5   :  { %4032 = vtanh.f32 %v3097_v30 }
0x13ed   :  { %v4031_v31 = vpop.eup %4030 }
0x13ee   :  { %v3100_v32 = vadd.f32 1.0, %v4031_v31 }
0x13ef   :  { %v4033_v33 = vpop.eup %4032 }
0x13f0   :  { %v3101_v36 = vadd.f32 1.0, %v4033_v33  ;;  %v3102_v37 = vmul.f32 %v3100_v32, %v3086_v34 }
0x13f2   :  { %v3103_v38 = vmul.f32 %v3101_v36, %v3087_v35 }
0x13f4   :  { %v3104_v39 = vpack.c.bf16 %v3103_v38, %v3102_v37 }
0x13f6   :  { %3763 = vmatmul.mubr.msk.bf16.vlgmr.msra.gmra.mrb[84].mxu1 %vm1681_vm2, %v3104_v39 }
0x14c9   :  { %v3179_v41 = vpop.f32.mrb[84].mxu1 }
0x14ca   :  { %v3180_v42 = vadd.f32 %v3350_v40, %v3179_v41  ;;  %v3764_v43 = vpop.f32.mrb[85].mxu1 }
0x14cb   :  { %v3182_v60 = vpop.f32.mrb[86].mxu1 }
0x14cc   :  { %v3183_v61 = vadd.f32 %v3350_v40, %v3182_v60  ;;  %v3765_v44 = vpop.f32.mrb[87].mxu1  ;;  %v3186_v45 = vadd.f32 %v3180_v42, %v3018_v3 }
0x14ce   :  { %v3190_v46 = vsel %vm263_vm12, %v3186_v45, 0.0  ;;  %v3187_v47 = vadd.f32 %v3183_v61, %v3019_v5 }
0x14cf   :  { %3191 = vadd.xlane.f32.xlu0 %v3190_v46 }
0x14d0   :  { %v3193_v48 = vsel %vm263_vm12, %v3187_v47, 0.0 }
0x14d1   :  { %3194 = vadd.xlane.f32.xlu1 %v3193_v48 }
0x155c   :  { %v3192_v49 = vpop.xlane.xlu0 %3191 }
0x155d   :  { %v3196_v50 = vmul.f32 0.03125, %v3192_v49 }
0x155e   :  { %v3195_v51 = vpop.xlane.xlu1 %3194 }
0x155f   :  { %v3198_v6 = vsub.f32 %v3186_v45, %v3196_v50  ;;  %v3197_v7 = vmul.f32 0.03125, %v3195_v51 }
0x1561   :  { %v3199_v52 = vsub.f32 %v3187_v47, %v3197_v7  ;;  %v3200_v53 = vmul.f32 %v3198_v6, %v3198_v6 }
0x1563   :  { %v3202_v18 = vsel %vm263_vm12, %v3200_v53, 0.0  ;;  %v3201_v54 = vmul.f32 %v3199_v52, %v3199_v52 }
0x1564   :  { %3203 = vadd.xlane.f32.xlu0 %v3202_v18 }
0x1565   :  { %v3205_v55 = vsel %vm263_vm12, %v3201_v54, 0.0 }
0x1566   :  { %3206 = vadd.xlane.f32.xlu1 %v3205_v55 }
0x15f1   :  { %v3204_v56 = vpop.xlane.xlu0 %3203 }
0x15f2   :  { %v3208_v57 = vmul.f32 0.03125, %v3204_v56 }
0x15f3   :  { %v3207_v58 = vpop.xlane.xlu1 %3206 }
0x15f4   :  { %v3210_v59 = vadd.f32 1e-12, %v3208_v57  ;;  %v3209_v62 = vmul.f32 0.03125, %v3207_v58 }
0x15f6   :  { %4034 = vrsqrt.f32 %v3210_v59  ;;  %v3211_v63 = vadd.f32 1e-12, %v3209_v62 }
0x15f8   :  { %4036 = vrsqrt.f32 %v3211_v63 }
0x1600   :  { %v4035_v28 = vpop.eup %4034 }
0x1601   :  { %v3214_v0 = vmul.f32 %v4035_v28, %v3198_v6 }
0x1602   :  { %v4037_v1 = vpop.eup %4036 }
0x1603   :  { %v3215_v3 = vmul.f32 %v4037_v1, %v3199_v52  ;;  %v3220_v5 = vmul.f32 %v3356_v2, %v3214_v0 }
0x1605   :  { %v3221_v8 = vmul.f32 %v3356_v2, %v3215_v3  ;;  %v3226_v11 = vadd.f32 %v3357_v9, %v3220_v5 }
0x1607   :  { %v3227_v10 = vadd.f32 %v3357_v9, %v3221_v8 }
0x1609   :  { %v3230_v13 = vrot.slane %v3227_v10, 7 }
0x160b   :  { %v3232_v14 = vsel %vm3231_vm3, %v3230_v13, %v3226_v11 }
0x160c   :  { %3235 = vst.msk [vmem:[#allocation2] sm:$0x3] %vm3234_vm4, %v3232_v14 }
0x160d   :  { %4049 = shalt.err (!%p4046_p4)
}
0x160e   :  { %s4050_s1 = scalar_lea.hbm %s4694_s3, 32 }
0x160f   :  { %p4051_p5 = scmp.ne.s32.totalorder %s4694_s3, %s4050_s1  ;;  %p4054_p6 = scmp.lt.u32.totalorder %s4050_s1, %s4694_s3 }
0x1611   :  { %p4056_p7 = pnand %p4054_p6, %p4051_p5 }
0x1613   :  { %4059 = shalt.err (!%p4056_p7)
}
0x1614   :  { %3245 = dma.vmem_to_hbm [thread:$0]  %s3243_s21, 32, %s4694_s3, [#allocation3]  }
0x1615   :  { %4060 = dma.done.wait [#allocation3], 32  }
0x1616   :  { %4061 = vsyncadd [#allocation3], 4294967264 }
0x1617   :  { %3249 = vsyncpa [#allocation3], 1 }

</bundles_post_ra>
